<compile_context>
chip_gen: v6e
topology: v6e:2x2x1
jax: 0.10.0
libtpu: 0.0.40
codegen_flags: <defaults>
</compile_context>

<pallas_src>
import functools

import numpy as np
import jax
import jax.numpy as jnp
from jax.experimental import pallas as pl
from jax.experimental.pallas import tpu as pltpu

# ---- static network geometry (implied by .view(-1, 135) after two 3x3 convs)
C_IN, H_IN, W_IN = 6, 7, 7
C1, H1, W1 = 10, 5, 5
C2, H2, W2 = 15, 3, 3
SHAPE_1 = C2 * H2 * W2          # 135
FC1_OUT = 1000

K_IN = C_IN * H_IN * W_IN       # 294 (input features; block == full dim, legal)
P1 = 256                        # conv1 features 250 -> 256 (lane-dense)
P2 = 256                        # conv2 features 135 -> 256
P3 = 1024                       # fc1   features 1000 -> 1024

ROW_BLOCK = 8                   # batch rows per grid step (sublane tile)


def _round_up(n, m):
    return ((n + m - 1) // m) * m


def _pad_to(a, shape):
    return jnp.pad(a, [(0, s - d) for d, s in zip(a.shape, shape)])


# --------------------------------------------------------------------------
# Fold a valid kxk cross-correlation (PyTorch Conv2d) into a dense matrix T:
#   y_flat = x_flat @ T, with x_flat / y_flat the per-image NCHW flatten.
# Done once at parameter-prep time, not per forward call.
# --------------------------------------------------------------------------
def _conv_to_matrix(w, h_in, w_in):
    c_out, c_in, kh, kw = w.shape
    h_out, w_out = h_in - kh + 1, w_in - kw + 1
    co, ci, dh, dw, oi, oj = np.meshgrid(
        np.arange(c_out), np.arange(c_in), np.arange(kh), np.arange(kw),
        np.arange(h_out), np.arange(w_out), indexing="ij")
    co, ci, dh, dw, oi, oj = (a.reshape(-1) for a in (co, ci, dh, dw, oi, oj))
    rows = ci * (h_in * w_in) + (oi + dh) * w_in + (oj + dw)
    cols = co * (h_out * w_out) + oi * w_out + oj
    vals = w[co, ci, dh, dw]
    t = jnp.zeros((c_in * h_in * w_in, c_out * h_out * w_out), jnp.float32)
    return t.at[rows, cols].set(vals)


# --------------------------------------------------------------------------
# The single fused Pallas kernel: conv1 -> conv2 -> fc1 -> fc2 -> softmax
# --------------------------------------------------------------------------
def _fused_net_kernel(x_ref, t1_ref, b1_ref, t2_ref, b2_ref,
                      w3_ref, b3_ref, w4_ref, b4_ref, o_ref, *, n_classes):
    # conv1 as Toeplitz matmul + bias + relu          [R,294]@[294,256]
    h = jnp.dot(x_ref[...], t1_ref[...], preferred_element_type=jnp.float32)
    h = jnp.maximum(h + b1_ref[...], 0.0)
    # conv2 as Toeplitz matmul + bias + relu          [R,256]@[256,256]
    h = jnp.dot(h, t2_ref[...], preferred_element_type=jnp.float32)
    h = jnp.maximum(h + b2_ref[...], 0.0)
    # fc1 + relu (bf16 weights, f32 accumulation)     [R,256]@[256,1024]
    h = jnp.dot(h.astype(jnp.bfloat16), w3_ref[...],
                preferred_element_type=jnp.float32)
    h = jnp.maximum(h + b3_ref[...], 0.0)
    # fc2                                             [R,1024]@[1024,128]
    logits = jnp.dot(h.astype(jnp.bfloat16), w4_ref[...],
                     preferred_element_type=jnp.float32)
    logits = logits + b4_ref[...]
    # mask padded logit columns, then softmax over dim=1
    col = jax.lax.broadcasted_iota(jnp.int32, logits.shape, 1)
    logits = jnp.where(col < n_classes, logits, -1e30)
    m = jnp.max(logits, axis=1, keepdims=True)
    e = jnp.exp(logits - m)
    denom = jnp.sum(e, axis=1, keepdims=True)
    o_ref[...] = e * pl.reciprocal(denom, approx=False)


# --------------------------------------------------------------------------
# Parameter prep (once): fold convs, pad everything lane-dense, cast fc->bf16
# --------------------------------------------------------------------------
def prepare_params(params, output_num):
    n_pad = _round_up(output_num, 128)
    t1 = _conv_to_matrix(params["conv1_w"], H_IN, W_IN)          # [294, 250]
    b1 = jnp.repeat(params["conv1_b"], H1 * W1)                  # [250]
    t2 = _conv_to_matrix(params["conv2_w"], H1, W1)              # [250, 135]
    b2 = jnp.repeat(params["conv2_b"], H2 * W2)                  # [135]
    return {
        "t1": _pad_to(t1, (K_IN, P1)),
        "b1": _pad_to(b1.reshape(1, -1), (1, P1)),
        "t2": _pad_to(t2, (P1, P2)),
        "b2": _pad_to(b2.reshape(1, -1), (1, P2)),
        "w3": _pad_to(params["fc1_w"], (P2, P3)).astype(jnp.bfloat16),
        "b3": _pad_to(params["fc1_b"].reshape(1, -1), (1, P3)),
        "w4": _pad_to(params["fc2_w"], (P3, n_pad)).astype(jnp.bfloat16),
        "b4": _pad_to(params["fc2_b"].reshape(1, -1), (1, n_pad)),
    }


def net_forward(x, prep, *, output_num):
    B = x.shape[0]
    n_pad = prep["w4"].shape[1]
    x_flat = x.reshape(B, K_IN)                  # NCHW flatten, matches .view
    b_pad = _round_up(max(B, ROW_BLOCK), ROW_BLOCK)
    if b_pad != B:
        x_flat = jnp.pad(x_flat, ((0, b_pad - B), (0, 0)))

    kernel = functools.partial(_fused_net_kernel, n_classes=output_num)
    full = lambda a: pl.BlockSpec(a.shape, lambda i: (0, 0))   # weight resident

    out = pl.pallas_call(
        kernel,
        out_shape=jax.ShapeDtypeStruct((b_pad, n_pad), jnp.float32),
        grid=(b_pad // ROW_BLOCK,),
        in_specs=[
            pl.BlockSpec((ROW_BLOCK, K_IN), lambda i: (i, 0)),
            full(prep["t1"]), full(prep["b1"]),
            full(prep["t2"]), full(prep["b2"]),
            full(prep["w3"]), full(prep["b3"]),
            full(prep["w4"]), full(prep["b4"]),
        ],
        out_specs=pl.BlockSpec((ROW_BLOCK, n_pad), lambda i: (i, 0)),
        compiler_params=pltpu.CompilerParams(
            dimension_semantics=("parallel",)),
    )(x_flat, prep["t1"], prep["b1"], prep["t2"], prep["b2"],
      prep["w3"], prep["b3"], prep["w4"], prep["b4"])
    return out[:B, :output_num]


# --------------------------------------------------------------------------
# Init (mirrors torch default U(-1/sqrt(fan_in), 1/sqrt(fan_in)); fc weights
# stored [in, out], i.e. transposed relative to torch's [out, in]).
# --------------------------------------------------------------------------
def init_params(key, output_num):
    ks = jax.random.split(key, 8)

    def unif(k, shape, fan_in):
        bound = float(1.0 / (fan_in ** 0.5))
        return jax.random.uniform(k, shape, jnp.float32, -bound, bound)

    return {
        "conv1_w": unif(ks[0], (C1, C_IN, 3, 3), C_IN * 9),
        "conv1_b": unif(ks[1], (C1,), C_IN * 9),
        "conv2_w": unif(ks[2], (C2, C1, 3, 3), C1 * 9),
        "conv2_b": unif(ks[3], (C2,), C1 * 9),
        "fc1_w": unif(ks[4], (SHAPE_1, FC1_OUT), SHAPE_1),
        "fc1_b": unif(ks[5], (FC1_OUT,), SHAPE_1),
        "fc2_w": unif(ks[6], (FC1_OUT, output_num), FC1_OUT),
        "fc2_b": unif(ks[7], (output_num,), FC1_OUT),
    }


def reference_forward(x, params):
    """Pure-JAX reference of the torch module (f32 everywhere)."""
    y = jax.lax.conv_general_dilated(
        x, params["conv1_w"], (1, 1), "VALID",
        dimension_numbers=("NCHW", "OIHW", "NCHW"))
    y = jnp.maximum(y + params["conv1_b"][None, :, None, None], 0.0)
    y = jax.lax.conv_general_dilated(
        y, params["conv2_w"], (1, 1), "VALID",
        dimension_numbers=("NCHW", "OIHW", "NCHW"))
    y = jnp.maximum(y + params["conv2_b"][None, :, None, None], 0.0)
    y = y.reshape(y.shape[0], -1)
    y = jnp.maximum(y @ params["fc1_w"] + params["fc1_b"], 0.0)
    y = y @ params["fc2_w"] + params["fc2_b"]
    return jax.nn.softmax(y, axis=1)


if __name__ == "__main__":
    key = jax.random.PRNGKey(0)
    k_x, k_p = jax.random.split(key)

    output_num = 10
    x = jax.random.normal(k_x, (2, C_IN, H_IN, W_IN), dtype=jnp.float32)
    params = init_params(k_p, output_num)
    prep = prepare_params(params, output_num)      # once, outside the forward

    fwd = jax.jit(functools.partial(net_forward, output_num=output_num))
    out = jax.block_until_ready(fwd(x, prep))

    assert out.shape == (2, output_num)
    assert bool(jnp.all(jnp.isfinite(out)))
    assert bool(jnp.allclose(jnp.sum(out, axis=1), 1.0, atol=1e-5))

    # functional check against a pure-JAX reference (loose tol for bf16 fc path)
    ref = jax.block_until_ready(reference_forward(x, params))
    assert bool(jnp.allclose(out, ref, atol=5e-2))

    print("KERNEL_OK")
</pallas_src>

<mosaic_0001>
module attributes {stable_mosaic.version = 11 : i64} {
  func.func @_fused_net_kernel(%arg0: i32, %arg1: memref<8x294xf32, #tpu.memory_space<vmem>>, %arg2: memref<294x256xf32, #tpu.memory_space<vmem>>, %arg3: memref<1x256xf32, #tpu.memory_space<vmem>>, %arg4: memref<256x256xf32, #tpu.memory_space<vmem>>, %arg5: memref<1x256xf32, #tpu.memory_space<vmem>>, %arg6: memref<256x1024xbf16, #tpu.memory_space<vmem>>, %arg7: memref<1x1024xf32, #tpu.memory_space<vmem>>, %arg8: memref<1024x128xbf16, #tpu.memory_space<vmem>>, %arg9: memref<1x128xf32, #tpu.memory_space<vmem>>, %arg10: memref<8x128xf32, #tpu.memory_space<vmem>>) attributes {dimension_semantics = [#tpu.dimension_semantics<parallel>], iteration_bounds = array<i64: 1>, scalar_prefetch = 0 : i64, scratch_operands = 0 : i64, tpu.core_type = #tpu.core_type<tc>, window_params = [{transform_indices = @transform_0, window_bounds = array<i64: 8, 294>}, {pipeline_mode = #tpu.pipeline_mode<synchronous>, transform_indices = @transform_1, window_bounds = array<i64: 294, 256>}, {pipeline_mode = #tpu.pipeline_mode<synchronous>, transform_indices = @transform_2, window_bounds = array<i64: 1, 256>}, {pipeline_mode = #tpu.pipeline_mode<synchronous>, transform_indices = @transform_3, window_bounds = array<i64: 256, 256>}, {pipeline_mode = #tpu.pipeline_mode<synchronous>, transform_indices = @transform_4, window_bounds = array<i64: 1, 256>}, {pipeline_mode = #tpu.pipeline_mode<synchronous>, transform_indices = @transform_5, window_bounds = array<i64: 256, 1024>}, {pipeline_mode = #tpu.pipeline_mode<synchronous>, transform_indices = @transform_6, window_bounds = array<i64: 1, 1024>}, {pipeline_mode = #tpu.pipeline_mode<synchronous>, transform_indices = @transform_7, window_bounds = array<i64: 1024, 128>}, {pipeline_mode = #tpu.pipeline_mode<synchronous>, transform_indices = @transform_8, window_bounds = array<i64: 1, 128>}, {transform_indices = @transform_9, window_bounds = array<i64: 8, 128>}]} {
    %c0 = arith.constant 0 : index
    %c0_0 = arith.constant 0 : index
    %0 = vector.load %arg1[%c0, %c0_0] : memref<8x294xf32, #tpu.memory_space<vmem>>, vector<8x294xf32>
    %c0_1 = arith.constant 0 : index
    %c0_2 = arith.constant 0 : index
    %1 = vector.load %arg2[%c0_1, %c0_2] : memref<294x256xf32, #tpu.memory_space<vmem>>, vector<294x256xf32>
    %cst = arith.constant dense<0.000000e+00> : vector<8x256xf32>
    %2 = tpu.matmul %0, %1, %cst {dimension_numbers = #tpu.dot_dimension_numbers<[1], [0], [0], [1], [0, 0, 1, 1], [], []>} : vector<8x294xf32>, vector<294x256xf32>, vector<8x256xf32> -> vector<8x256xf32>
    %c0_3 = arith.constant 0 : index
    %c0_4 = arith.constant 0 : index
    %3 = vector.load %arg3[%c0_3, %c0_4] : memref<1x256xf32, #tpu.memory_space<vmem>>, vector<1x256xf32>
    %4 = vector.broadcast %3 : vector<1x256xf32> to vector<8x256xf32>
    %5 = arith.addf %2, %4 : vector<8x256xf32>
    %cst_5 = arith.constant 0.000000e+00 : f32
    %6 = vector.broadcast %cst_5 : f32 to vector<8x256xf32>
    %7 = arith.maximumf %5, %6 : vector<8x256xf32>
    %c0_6 = arith.constant 0 : index
    %c0_7 = arith.constant 0 : index
    %8 = vector.load %arg4[%c0_6, %c0_7] : memref<256x256xf32, #tpu.memory_space<vmem>>, vector<256x256xf32>
    %cst_8 = arith.constant dense<0.000000e+00> : vector<8x256xf32>
    %9 = tpu.matmul %7, %8, %cst_8 {dimension_numbers = #tpu.dot_dimension_numbers<[1], [0], [0], [1], [0, 0, 1, 1], [], []>} : vector<8x256xf32>, vector<256x256xf32>, vector<8x256xf32> -> vector<8x256xf32>
    %c0_9 = arith.constant 0 : index
    %c0_10 = arith.constant 0 : index
    %10 = vector.load %arg5[%c0_9, %c0_10] : memref<1x256xf32, #tpu.memory_space<vmem>>, vector<1x256xf32>
    %11 = vector.broadcast %10 : vector<1x256xf32> to vector<8x256xf32>
    %12 = arith.addf %9, %11 : vector<8x256xf32>
    %cst_11 = arith.constant 0.000000e+00 : f32
    %13 = vector.broadcast %cst_11 : f32 to vector<8x256xf32>
    %14 = arith.maximumf %12, %13 : vector<8x256xf32>
    %15 = arith.truncf %14 : vector<8x256xf32> to vector<8x256xbf16>
    %c0_12 = arith.constant 0 : index
    %c0_13 = arith.constant 0 : index
    %16 = vector.load %arg6[%c0_12, %c0_13] : memref<256x1024xbf16, #tpu.memory_space<vmem>>, vector<256x1024xbf16>
    %cst_14 = arith.constant dense<0.000000e+00> : vector<8x1024xf32>
    %17 = tpu.matmul %15, %16, %cst_14 {dimension_numbers = #tpu.dot_dimension_numbers<[1], [0], [0], [1], [0, 0, 1, 1], [], []>} : vector<8x256xbf16>, vector<256x1024xbf16>, vector<8x1024xf32> -> vector<8x1024xf32>
    %c0_15 = arith.constant 0 : index
    %c0_16 = arith.constant 0 : index
    %18 = vector.load %arg7[%c0_15, %c0_16] : memref<1x1024xf32, #tpu.memory_space<vmem>>, vector<1x1024xf32>
    %19 = vector.broadcast %18 : vector<1x1024xf32> to vector<8x1024xf32>
    %20 = arith.addf %17, %19 : vector<8x1024xf32>
    %cst_17 = arith.constant 0.000000e+00 : f32
    %21 = vector.broadcast %cst_17 : f32 to vector<8x1024xf32>
    %22 = arith.maximumf %20, %21 : vector<8x1024xf32>
    %23 = arith.truncf %22 : vector<8x1024xf32> to vector<8x1024xbf16>
    %c0_18 = arith.constant 0 : index
    %c0_19 = arith.constant 0 : index
    %24 = vector.load %arg8[%c0_18, %c0_19] : memref<1024x128xbf16, #tpu.memory_space<vmem>>, vector<1024x128xbf16>
    %cst_20 = arith.constant dense<0.000000e+00> : vector<8x128xf32>
    %25 = tpu.matmul %23, %24, %cst_20 {dimension_numbers = #tpu.dot_dimension_numbers<[1], [0], [0], [1], [0, 0, 1, 1], [], []>} : vector<8x1024xbf16>, vector<1024x128xbf16>, vector<8x128xf32> -> vector<8x128xf32>
    %c0_21 = arith.constant 0 : index
    %c0_22 = arith.constant 0 : index
    %26 = vector.load %arg9[%c0_21, %c0_22] : memref<1x128xf32, #tpu.memory_space<vmem>>, vector<1x128xf32>
    %27 = vector.broadcast %26 : vector<1x128xf32> to vector<8x128xf32>
    %28 = arith.addf %25, %27 : vector<8x128xf32>
    %29 = tpu.iota {dimensions = array<i32: 1>} : vector<8x128xi32>
    %c10_i32 = arith.constant 10 : i32
    %30 = vector.broadcast %c10_i32 : i32 to vector<8x128xi32>
    %31 = arith.cmpi slt, %29, %30 : vector<8x128xi32>
    %cst_23 = arith.constant -1.000000e+30 : f32
    %32 = vector.broadcast %cst_23 : f32 to vector<8x128xf32>
    %33 = arith.select %31, %28, %32 : vector<8x128xi1>, vector<8x128xf32>
    %cst_24 = arith.constant dense<0xFF800000> : vector<8xf32>
    %34 = vector.multi_reduction <maximumf>, %33, %cst_24 [1] : vector<8x128xf32> to vector<8xf32>
    %35 = vector.shape_cast %34 : vector<8xf32> to vector<8x1xf32>
    %36 = vector.broadcast %35 : vector<8x1xf32> to vector<8x128xf32>
    %37 = arith.subf %33, %36 : vector<8x128xf32>
    %38 = math.exp %37 : vector<8x128xf32>
    %cst_25 = arith.constant dense<0.000000e+00> : vector<8xf32>
    %39 = vector.multi_reduction <add>, %38, %cst_25 [1] : vector<8x128xf32> to vector<8xf32>
    %40 = vector.shape_cast %39 : vector<8xf32> to vector<8x1xf32>
    %41 = tpu.reciprocal %40 : vector<8x1xf32> -> vector<8x1xf32>
    %42 = vector.broadcast %41 : vector<8x1xf32> to vector<8x128xf32>
    %43 = arith.mulf %38, %42 : vector<8x128xf32>
    %c0_26 = arith.constant 0 : index
    %c0_27 = arith.constant 0 : index
    %44 = vector.load %arg10[%c0_26, %c0_27] : memref<8x128xf32, #tpu.memory_space<vmem>>, vector<8x128xf32>
    tpu.vector_store %arg10[%c0_26, %c0_27], %43 {strides = array<i32>} : memref<8x128xf32, #tpu.memory_space<vmem>>, vector<8x128xf32>,
    return
  }
  func.func @transform_0(%arg0: i32) -> (i32, i32) {
    %c0_i32 = arith.constant 0 : i32
    %c0_i32_0 = arith.constant 0 : i32
    return %arg0, %c0_i32 : i32, i32
  }
  func.func @transform_1(%arg0: i32) -> (i32, i32) {
    %c0_i32 = arith.constant 0 : i32
    %c0_i32_0 = arith.constant 0 : i32
    %c0_i32_1 = arith.constant 0 : i32
    return %c0_i32, %c0_i32_0 : i32, i32
  }
  func.func @transform_2(%arg0: i32) -> (i32, i32) {
    %c0_i32 = arith.constant 0 : i32
    %c0_i32_0 = arith.constant 0 : i32
    %c0_i32_1 = arith.constant 0 : i32
    return %c0_i32, %c0_i32_0 : i32, i32
  }
  func.func @transform_3(%arg0: i32) -> (i32, i32) {
    %c0_i32 = arith.constant 0 : i32
    %c0_i32_0 = arith.constant 0 : i32
    %c0_i32_1 = arith.constant 0 : i32
    return %c0_i32, %c0_i32_0 : i32, i32
  }
  func.func @transform_4(%arg0: i32) -> (i32, i32) {
    %c0_i32 = arith.constant 0 : i32
    %c0_i32_0 = arith.constant 0 : i32
    %c0_i32_1 = arith.constant 0 : i32
    return %c0_i32, %c0_i32_0 : i32, i32
  }
  func.func @transform_5(%arg0: i32) -> (i32, i32) {
    %c0_i32 = arith.constant 0 : i32
    %c0_i32_0 = arith.constant 0 : i32
    %c0_i32_1 = arith.constant 0 : i32
    return %c0_i32, %c0_i32_0 : i32, i32
  }
  func.func @transform_6(%arg0: i32) -> (i32, i32) {
    %c0_i32 = arith.constant 0 : i32
    %c0_i32_0 = arith.constant 0 : i32
    %c0_i32_1 = arith.constant 0 : i32
    return %c0_i32, %c0_i32_0 : i32, i32
  }
  func.func @transform_7(%arg0: i32) -> (i32, i32) {
    %c0_i32 = arith.constant 0 : i32
    %c0_i32_0 = arith.constant 0 : i32
    %c0_i32_1 = arith.constant 0 : i32
    return %c0_i32, %c0_i32_0 : i32, i32
  }
  func.func @transform_8(%arg0: i32) -> (i32, i32) {
    %c0_i32 = arith.constant 0 : i32
    %c0_i32_0 = arith.constant 0 : i32
    %c0_i32_1 = arith.constant 0 : i32
    return %c0_i32, %c0_i32_0 : i32, i32
  }
  func.func @transform_9(%arg0: i32) -> (i32, i32) {
    %c0_i32 = arith.constant 0 : i32
    %c0_i32_0 = arith.constant 0 : i32
    return %arg0, %c0_i32 : i32, i32
  }
}

</mosaic_0001>

<bundles_post_ra>
// kernel: net_forward.1
= control target key start
LH: loop header
LB: loop body
LE: loop exit
PB: predicated region body
PF: predicated region fallthrough
CT: control target
= control target key end

     0   :  { %14 = vsyncpa [#allocation3], 0  ;;  %s2768_s0 = inlined_call_operand.vmem [shape: f32[8,294], index: 0, kind: input, shape index: {}]   ;;  %s2769_s1 = inlined_call_operand.hbm [shape: f32[294,256], index: 1, kind: input, shape index: {}]   ;;  %s2770_s2 = inlined_call_operand.vmem [shape: f32[1,256], index: 2, kind: input, shape index: {}]   ;;  %s2771_s3 = inlined_call_operand.hbm [shape: f32[256,256], index: 3, kind: input, shape index: {}]   ;;  %s2772_s4 = inlined_call_operand.vmem [shape: f32[1,256], index: 4, kind: input, shape index: {}]   ;;  %s2773_s5 = inlined_call_operand.hbm [shape: bf16[256,1024], index: 5, kind: input, shape index: {}]   ;;  %s2774_s6 = inlined_call_operand.vmem [shape: f32[1,1024], index: 6, kind: input, shape index: {}]   ;;  %s2775_s7 = inlined_call_operand.hbm [shape: bf16[1024,128], index: 7, kind: input, shape index: {}]   ;;  %s2776_s8 = inlined_call_operand.vmem [shape: f32[1,128], index: 8, kind: input, shape index: {}]   ;;  %s2777_s9 = inlined_call_operand.vmem [shape: f32[8,128], index: 9, kind: output, shape index: {}]  }
   0x1   :  { %15 = vsyncpa [#allocation5], 0 }
   0x2   :  { %16 = vsyncpa [#allocation8], 0  ;;  %s2622_s30 = smov [#allocation4]   ;;  %s2623_s11 = smov [#allocation2]  }
   0x3   :  { %s38_s10 = sshll.u32 %s2622_s30, 4  ;;  %s24_s12 = sshll.u32 %s2623_s11, 4  ;;  %s39_s10 = int_to_ptr.vmem [resolvable:$true] %s38_s10  ;;  %s25_s12 = int_to_ptr.vmem [resolvable:$true] %s24_s12 }
   0x4   :  { %s2544_s13 = scalar_lea.vmem %s39_s10, 8192  ;;  %p2549_p1 = scmp.lt.s32.totalorder %s39_s10, %s39_s10 }
   0x5   :  { %p2545_p0 = scmp.ne.s32.totalorder %s39_s10, %s2544_s13  ;;  %p2550_p2 = scmp.lt.s32.totalorder %s2544_s13, %s2544_s13 }
   0x7   :  { %p2551_p3 = por %p2550_p2, %p2549_p1 }
   0x9   :  { %p2552_p4 = pnand %p2551_p3, %p2545_p0 }
   0xb   :  { %2555 = shalt.err (!%p2552_p4)
}
   0xc   :  { %s2624_s14 = smov 256   ;;  %s2625_s15 = smov 16  }
   0xd   :  { %44 = dma.hbm_to_vmem [thread:$0]  %s2771_s3, 8192, %s39_s10, [#allocation5], %s2624_s14, %s2624_s14, %s2625_s15  }
   0xe   :  { %s2564_s18 = scalar_lea.vmem %s25_s12, 9472  ;;  %p2569_p6 = scmp.lt.s32.totalorder %s25_s12, %s25_s12 }
   0xf   :  { %p2565_p5 = scmp.ne.s32.totalorder %s25_s12, %s2564_s18  ;;  %p2570_p7 = scmp.lt.s32.totalorder %s2564_s18, %s2564_s18 }
  0x11   :  { %p2571_p8 = por %p2570_p7, %p2569_p6 }
  0x13   :  { %p2572_p9 = pnand %p2571_p8, %p2565_p5 }
  0x15   :  { %2575 = shalt.err (!%p2572_p9)
}
  0x16   :  { %30 = dma.hbm_to_vmem [thread:$0]  %s2769_s1, 9472, %s25_s12, [#allocation3], %s2624_s14, %s2624_s14, %s2625_s15  }
  0x17   :  { %s2626_s21 = smov [#allocation6]  }
  0x18   :  { %s52_s22 = sshll.u32 %s2626_s21, 4  ;;  %s53_s22 = int_to_ptr.vmem [resolvable:$true] %s52_s22 }
  0x19   :  { %s2584_s23 = scalar_lea.vmem %s53_s22, 16384  ;;  %p2589_p11 = scmp.lt.s32.totalorder %s53_s22, %s53_s22 }
  0x1a   :  { %p2585_p10 = scmp.ne.s32.totalorder %s53_s22, %s2584_s23  ;;  %p2590_p12 = scmp.lt.s32.totalorder %s2584_s23, %s2584_s23 }
  0x1c   :  { %p2591_p13 = por %p2590_p12, %p2589_p11 }
  0x1e   :  { %p2592_p0 = pnand %p2591_p13, %p2585_p10 }
  0x20   :  { %2595 = shalt.err (!%p2592_p0)
}
  0x21   :  { %s2627_s3 = smov 512   ;;  %s2628_s24 = smov 32  }
  0x22   :  { %58 = dma.hbm_to_vmem [thread:$0]  %s2773_s5, 16384, %s53_s22, [#allocation5], %s2627_s3, %s2627_s3, %s2628_s24  }
  0x23   :  { %s2629_s27 = smov [#allocation7]  }
  0x24   :  { %s66_s28 = sshll.u32 %s2629_s27, 4  ;;  %s67_s28 = int_to_ptr.vmem [resolvable:$true] %s66_s28 }
  0x25   :  { %s2604_s1 = scalar_lea.vmem %s67_s28, 8192  ;;  %p2609_p2 = scmp.lt.s32.totalorder %s67_s28, %s67_s28 }
  0x26   :  { %p2605_p1 = scmp.ne.s32.totalorder %s67_s28, %s2604_s1  ;;  %p2610_p3 = scmp.lt.s32.totalorder %s2604_s1, %s2604_s1 }
  0x28   :  { %p2611_p4 = por %p2610_p3, %p2609_p2 }
  0x2a   :  { %p2612_p5 = pnand %p2611_p4, %p2605_p1 }
  0x2c   :  { %2615 = shalt.err (!%p2612_p5)
}
  0x2d   :  { %s2630_s29 = smov 64   ;;  %s2631_s30 = smov 4  }
  0x2e   :  { %72 = dma.hbm_to_vmem [thread:$0]  %s2775_s7, 8192, %s67_s28, [#allocation8], %s2630_s29, %s2630_s29, %s2631_s30  }
  0x2f   :  { %2616 = dma.done.wait [#allocation3], 9472  }
  0x30   :  { %2617 = vsyncadd [#allocation3], 4294957824 }
  0x31   :  { %2618 = dma.done.wait [#allocation5], 24576  }
  0x32   :  { %2619 = vsyncadd [#allocation5], 4294942720 }
  0x33   :  { %2620 = dma.done.wait [#allocation8], 8192  }
  0x34   :  { %2621 = vsyncadd [#allocation8], 4294959104  ;;  %v2632_v0 = vmov 0.0   ;;  %v122_v1 = vld [vmem:[#allocation2 + $0xf8] sm:$0xff]  ;;  %v121_v2 = vld [vmem:[#allocation2 + $0xf0] sm:$0xff]  ;;  %vm181_vm0 = vcmask 1045504  }
  0x35   :  { %323 = vmatprep.mubr.f32.mxu1 %v2632_v0  ;;  %v120_v3 = vld [vmem:[#allocation2 + $0xe8] sm:$0xff]  ;;  %188 = vmatprep.subr.mxu0 %v122_v1  ;;  %v119_v4 = vld [vmem:[#allocation2 + $0xe0] sm:$0xff]  ;;  %v118_v5 = vld [vmem:[#allocation2 + $0xd8] sm:$0xff]  ;;  %vm177_vm1 = vcmask 310272  }
  0x36   :  { %189 = vmatpush1.msra.mxu0 %v121_v2  ;;  %v117_v6 = vld [vmem:[#allocation2 + $0xd0] sm:$0xff]  ;;  %v116_v7 = vld [vmem:[#allocation2 + $0xc8] sm:$0xff]  ;;  %v115_v8 = vld [vmem:[#allocation2 + $0xc0] sm:$0xff] }
  0x37   :  { %190 = vmatprep.subr.mxu0 %v120_v3  ;;  %v114_v9 = vld [vmem:[#allocation2 + $0xb8] sm:$0xff]  ;;  %v113_v10 = vld [vmem:[#allocation2 + $0xb0] sm:$0xff]  ;;  %v112_v11 = vld [vmem:[#allocation2 + $0xa8] sm:$0xff] }
  0x38   :  { %191 = vmatpush1.msra.mxu0 %v119_v4  ;;  %v111_v12 = vld [vmem:[#allocation2 + $0xa0] sm:$0xff]  ;;  %v110_v13 = vld [vmem:[#allocation2 + $0x98] sm:$0xff]  ;;  %v109_v14 = vld [vmem:[#allocation2 + $0x90] sm:$0xff] }
  0x39   :  { %192 = vmatprep.subr.mxu0 %v118_v5  ;;  %v108_v15 = vld [vmem:[#allocation2 + $0x88] sm:$0xff]  ;;  %v107_v16 = vld [vmem:[#allocation2 + $0x80] sm:$0xff]  ;;  %v106_v17 = vld [vmem:[#allocation2 + $0x78] sm:$0xff] }
  0x3a   :  { %193 = vmatpush1.msra.mxu0 %v117_v6  ;;  %v105_v18 = vld [vmem:[#allocation2 + $0x70] sm:$0xff]  ;;  %v104_v19 = vld [vmem:[#allocation2 + $0x68] sm:$0xff]  ;;  %v103_v20 = vld [vmem:[#allocation2 + $0x60] sm:$0xff] }
  0x3b   :  { %194 = vmatprep.subr.mxu0 %v116_v7  ;;  %v102_v21 = vld [vmem:[#allocation2 + $0x58] sm:$0xff]  ;;  %v164_v22 = vld [vmem:[#allocation2 + $0x248] sm:$0x3f]  ;;  %v101_v23 = vld [vmem:[#allocation2 + $0x50] sm:$0xff] }
  0x3c   :  { %195 = vmatpush1.msra.mxu0 %v115_v8  ;;  %2173 = vmatprep.subr.msk.mxu1 %vm181_vm0, %v164_v22  ;;  %v163_v24 = vld [vmem:[#allocation2 + $0x240] sm:$0x3f]  ;;  %v162_v25 = vld [vmem:[#allocation2 + $0x238] sm:$0xff]  ;;  %v100_v26 = vld [vmem:[#allocation2 + $0x48] sm:$0xff] }
  0x3d   :  { %196 = vmatprep.subr.mxu0 %v114_v9  ;;  %2174 = vmatpush1.msk.msra.mxu1 %vm181_vm0, %v163_v24  ;;  %v161_v27 = vld [vmem:[#allocation2 + $0x230] sm:$0xff]  ;;  %v99_v28 = vld [vmem:[#allocation2 + $0x40] sm:$0xff]  ;;  %v160_v29 = vld [vmem:[#allocation2 + $0x228] sm:$0xff] }
  0x3e   :  { %197 = vmatpush1.msra.mxu0 %v113_v10  ;;  %283 = vmatprep.subr.mxu1 %v162_v25  ;;  %v159_v30 = vld [vmem:[#allocation2 + $0x220] sm:$0xff]  ;;  %v98_v31 = vld [vmem:[#allocation2 + $0x38] sm:$0xff]  ;;  %v97_v33 = vld [vmem:[#allocation2 + $0x30] sm:$0xff] }
  0x3f   :  { %198 = vmatprep.subr.mxu0 %v112_v11  ;;  %284 = vmatpush1.msra.mxu1 %v161_v27  ;;  %v158_v32 = vld [vmem:[#allocation2 + $0x218] sm:$0xff]  ;;  %v157_v34 = vld [vmem:[#allocation2 + $0x210] sm:$0xff]  ;;  %v96_v35 = vld [vmem:[#allocation2 + $0x28] sm:$0xff] }
  0x40   :  { %199 = vmatpush1.msra.mxu0 %v111_v12  ;;  %285 = vmatprep.subr.mxu1 %v160_v29  ;;  %v156_v36 = vld [vmem:[#allocation2 + $0x208] sm:$0xff]  ;;  %v95_v37 = vld [vmem:[#allocation2 + $0x20] sm:$0xff]  ;;  %v94_v39 = vld [vmem:[#allocation2 + $0x18] sm:$0xff] }
  0x41   :  { %200 = vmatprep.subr.mxu0 %v110_v13  ;;  %286 = vmatpush1.msra.mxu1 %v159_v30  ;;  %v89_v38 = vld [vmem:[%s2768_s0 + $0x8] sm:$0xff]  ;;  %v155_v40 = vld [vmem:[#allocation2 + $0x200] sm:$0xff]  ;;  %v93_v41 = vld [vmem:[#allocation2 + $0x10] sm:$0xff] }
  0x42   :  { %201 = vmatpush1.msra.mxu0 %v109_v14  ;;  %287 = vmatprep.subr.mxu1 %v158_v32  ;;  %v90_v42 = vld [vmem:[%s2768_s0 + $0x10] sm:$0xff]  ;;  %v92_v43 = vld [vmem:[#allocation2 + $0x8] sm:$0xff]  ;;  %v91_v45 = vld [vmem:[#allocation2] sm:$0xff] }
  0x43   :  { %202 = vmatprep.subr.mxu0 %v108_v15  ;;  %288 = vmatpush1.msra.mxu1 %v157_v34  ;;  %v363_v44 = vld [vmem:[#allocation4 + $0xf8] sm:$0xff]  ;;  %v362_v46 = vld [vmem:[#allocation4 + $0xf0] sm:$0xff]  ;;  %v154_v47 = vld [vmem:[#allocation2 + $0x1f8] sm:$0xff] }
  0x44   :  { %203 = vmatpush1.msra.mxu0 %v107_v16  ;;  %289 = vmatprep.subr.mxu1 %v156_v36  ;;  %v361_v48 = vld [vmem:[#allocation4 + $0xe8] sm:$0xff]  ;;  %v153_v49 = vld [vmem:[#allocation2 + $0x1f0] sm:$0xff]  ;;  %v152_v51 = vld [vmem:[#allocation2 + $0x1e8] sm:$0xff] }
  0x45   :  { %204 = vmatprep.subr.mxu0 %v106_v17  ;;  %252 = vmatprep.mubr.f32.mxu0 %v89_v38  ;;  %v360_v50 = vld [vmem:[#allocation4 + $0xe0] sm:$0xff]  ;;  %v359_v52 = vld [vmem:[#allocation4 + $0xd8] sm:$0xff]  ;;  %v151_v53 = vld [vmem:[#allocation2 + $0x1e0] sm:$0xff] }
  0x46   :  { %205 = vmatpush1.msra.mxu0 %v105_v18  ;;  %290 = vmatpush1.msra.mxu1 %v155_v40  ;;  %v358_v54 = vld [vmem:[#allocation4 + $0xd0] sm:$0xff]  ;;  %v150_v55 = vld [vmem:[#allocation2 + $0x1d8] sm:$0xff]  ;;  %v149_v57 = vld [vmem:[#allocation2 + $0x1d0] sm:$0xff] }
  0x47   :  { %206 = vmatprep.subr.mxu0 %v104_v19  ;;  %2175 = vmatmul.mubr.msk.f32.vlgmr.msra.gmra.mxu1 %vm177_vm1, %v90_v42  ;;  %v357_v56 = vld [vmem:[#allocation4 + $0xc8] sm:$0xff]  ;;  %v356_v58 = vld [vmem:[#allocation4 + $0xc0] sm:$0xff]  ;;  %v148_v59 = vld [vmem:[#allocation2 + $0x1c8] sm:$0xff] }
  0x48   :  { %207 = vmatpush1.msra.mxu0 %v103_v20  ;;  %408 = vmatprep.subr.mxu1 %v363_v44  ;;  %v355_v60 = vld [vmem:[#allocation4 + $0xb8] sm:$0xff]  ;;  %v147_v61 = vld [vmem:[#allocation2 + $0x1c0] sm:$0xff]  ;;  %v146_v63 = vld [vmem:[#allocation2 + $0x1b8] sm:$0xff] }
  0x49   :  { %208 = vmatprep.subr.mxu0 %v102_v21  ;;  %409 = vmatpush1.msra.mxu1 %v362_v46  ;;  %v354_v62 = vld [vmem:[#allocation4 + $0xb0] sm:$0xff]  ;;  %v353_v0 = vld [vmem:[#allocation4 + $0xa8] sm:$0xff]  ;;  %v145_v1 = vld [vmem:[#allocation2 + $0x1b0] sm:$0xff] }
  0x4a   :  { %209 = vmatpush1.msra.mxu0 %v101_v23  ;;  %410 = vmatprep.subr.mxu1 %v361_v48  ;;  %v352_v2 = vld [vmem:[#allocation4 + $0xa0] sm:$0xff]  ;;  %v144_v3 = vld [vmem:[#allocation2 + $0x1a8] sm:$0xff]  ;;  %v143_v5 = vld [vmem:[#allocation2 + $0x1a0] sm:$0xff] }
  0x4b   :  { %210 = vmatprep.subr.mxu0 %v100_v26  ;;  %411 = vmatpush1.msra.mxu1 %v360_v50  ;;  %v351_v4 = vld [vmem:[#allocation4 + $0x98] sm:$0xff]  ;;  %v142_v6 = vld [vmem:[#allocation2 + $0x198] sm:$0xff]  ;;  %v350_v7 = vld [vmem:[#allocation4 + $0x90] sm:$0xff] }
  0x4c   :  { %211 = vmatpush1.msra.mxu0 %v99_v28  ;;  %412 = vmatprep.subr.mxu1 %v359_v52  ;;  %v141_v8 = vld [vmem:[#allocation2 + $0x190] sm:$0xff]  ;;  %v140_v9 = vld [vmem:[#allocation2 + $0x188] sm:$0xff]  ;;  %v349_v10 = vld [vmem:[#allocation4 + $0x88] sm:$0xff] }
  0x4d   :  { %212 = vmatprep.subr.mxu0 %v98_v31  ;;  %413 = vmatpush1.msra.mxu1 %v358_v54  ;;  %v139_v11 = vld [vmem:[#allocation2 + $0x180] sm:$0xff]  ;;  %v348_v12 = vld [vmem:[#allocation4 + $0x80] sm:$0xff]  ;;  %v347_v13 = vld [vmem:[#allocation4 + $0x78] sm:$0xff] }
  0x4e   :  { %213 = vmatpush1.msra.mxu0 %v97_v33  ;;  %414 = vmatprep.subr.mxu1 %v357_v56  ;;  %v346_v14 = vld [vmem:[#allocation4 + $0x70] sm:$0xff]  ;;  %v138_v15 = vld [vmem:[#allocation2 + $0x178] sm:$0xff]  ;;  %v137_v17 = vld [vmem:[#allocation2 + $0x170] sm:$0xff] }
  0x4f   :  { %214 = vmatprep.subr.mxu0 %v96_v35  ;;  %415 = vmatpush1.msra.mxu1 %v356_v58  ;;  %v345_v16 = vld [vmem:[#allocation4 + $0x68] sm:$0xff]  ;;  %v344_v18 = vld [vmem:[#allocation4 + $0x60] sm:$0xff]  ;;  %v136_v19 = vld [vmem:[#allocation2 + $0x168] sm:$0xff] }
  0x50   :  { %215 = vmatpush1.msra.mxu0 %v95_v37  ;;  %416 = vmatprep.subr.mxu1 %v355_v60  ;;  %v343_v20 = vld [vmem:[#allocation4 + $0x58] sm:$0xff]  ;;  %v135_v21 = vld [vmem:[#allocation2 + $0x160] sm:$0xff]  ;;  %v134_v23 = vld [vmem:[#allocation2 + $0x158] sm:$0xff] }
  0x51   :  { %216 = vmatprep.subr.mxu0 %v94_v39  ;;  %417 = vmatpush1.msra.mxu1 %v354_v62  ;;  %v342_v22 = vld [vmem:[#allocation4 + $0x50] sm:$0xff]  ;;  %v341_v24 = vld [vmem:[#allocation4 + $0x48] sm:$0xff]  ;;  %v133_v25 = vld [vmem:[#allocation2 + $0x150] sm:$0xff] }
  0x52   :  { %217 = vmatpush1.msra.mxu0 %v93_v41  ;;  %418 = vmatprep.subr.mxu1 %v353_v0  ;;  %v340_v26 = vld [vmem:[#allocation4 + $0x40] sm:$0xff]  ;;  %v132_v27 = vld [vmem:[#allocation2 + $0x148] sm:$0xff]  ;;  %v131_v29 = vld [vmem:[#allocation2 + $0x140] sm:$0xff] }
  0x53   :  { %218 = vmatprep.subr.mxu0 %v92_v43  ;;  %419 = vmatpush1.msra.mxu1 %v352_v2  ;;  %v339_v28 = vld [vmem:[#allocation4 + $0x38] sm:$0xff]  ;;  %v338_v30 = vld [vmem:[#allocation4 + $0x30] sm:$0xff]  ;;  %v130_v31 = vld [vmem:[#allocation2 + $0x138] sm:$0xff] }
  0x54   :  { %219 = vmatpush1.msra.mxu0 %v91_v45  ;;  %420 = vmatprep.subr.mxu1 %v351_v4  ;;  %v337_v32 = vld [vmem:[#allocation4 + $0x28] sm:$0xff]  ;;  %v129_v33 = vld [vmem:[#allocation2 + $0x130] sm:$0xff]  ;;  %v128_v35 = vld [vmem:[#allocation2 + $0x128] sm:$0xff] }
  0x55   :  { %220 = vmatprep.subr.mxu0 %v154_v47  ;;  %421 = vmatpush1.msra.mxu1 %v350_v7  ;;  %v336_v34 = vld [vmem:[#allocation4 + $0x20] sm:$0xff]  ;;  %v335_v36 = vld [vmem:[#allocation4 + $0x18] sm:$0xff]  ;;  %v127_v37 = vld [vmem:[#allocation2 + $0x120] sm:$0xff] }
  0x56   :  { %221 = vmatpush2.msra.mxu0 %v153_v49  ;;  %422 = vmatprep.subr.mxu1 %v349_v10  ;;  %v334_v38 = vld [vmem:[#allocation4 + $0x10] sm:$0xff]  ;;  %v126_v39 = vld [vmem:[#allocation2 + $0x118] sm:$0xff]  ;;  %v125_v41 = vld [vmem:[#allocation2 + $0x110] sm:$0xff] }
  0x57   :  { %222 = vmatprep.subr.mxu0 %v152_v51  ;;  %423 = vmatpush1.msra.mxu1 %v348_v12  ;;  %v333_v40 = vld [vmem:[#allocation4 + $0x8] sm:$0xff]  ;;  %v332_v42 = vld [vmem:[#allocation4] sm:$0xff]  ;;  %v124_v43 = vld [vmem:[#allocation2 + $0x108] sm:$0xff] }
  0x58   :  { %223 = vmatpush2.msra.mxu0 %v151_v53  ;;  %424 = vmatprep.subr.mxu1 %v347_v13  ;;  %v395_v44 = vld [vmem:[#allocation4 + $0x1f8] sm:$0xff]  ;;  %v123_v45 = vld [vmem:[#allocation2 + $0x100] sm:$0xff]  ;;  %v393_v48 = vld [vmem:[#allocation4 + $0x1e8] sm:$0xff] }
  0x59   :  { %224 = vmatprep.subr.mxu0 %v150_v55  ;;  %425 = vmatpush1.msra.mxu1 %v346_v14  ;;  %v394_v46 = vld [vmem:[#allocation4 + $0x1f0] sm:$0xff]  ;;  %v392_v49 = vld [vmem:[#allocation4 + $0x1e0] sm:$0xff]  ;;  %v391_v50 = vld [vmem:[#allocation4 + $0x1d8] sm:$0xff] }
  0x5a   :  { %225 = vmatpush2.msra.mxu0 %v149_v57  ;;  %426 = vmatprep.subr.mxu1 %v345_v16  ;;  %v88_v47 = vld [vmem:[%s2768_s0] sm:$0xff]  ;;  %v389_v52 = vld [vmem:[#allocation4 + $0x1c8] sm:$0xff]  ;;  %v388_v53 = vld [vmem:[#allocation4 + $0x1c0] sm:$0xff] }
  0x5b   :  { %226 = vmatprep.subr.mxu0 %v148_v59  ;;  %427 = vmatpush1.msra.mxu1 %v344_v18  ;;  %v390_v51 = vld [vmem:[#allocation4 + $0x1d0] sm:$0xff]  ;;  %v387_v54 = vld [vmem:[#allocation4 + $0x1b8] sm:$0xff]  ;;  %v385_v56 = vld [vmem:[#allocation4 + $0x1a8] sm:$0xff] }
  0x5c   :  { %227 = vmatpush2.msra.mxu0 %v147_v61  ;;  %428 = vmatprep.subr.mxu1 %v343_v20  ;;  %v386_v55 = vld [vmem:[#allocation4 + $0x1b0] sm:$0xff]  ;;  %v384_v57 = vld [vmem:[#allocation4 + $0x1a0] sm:$0xff]  ;;  %v383_v58 = vld [vmem:[#allocation4 + $0x198] sm:$0xff] }
  0x5d   :  { %228 = vmatprep.subr.mxu0 %v146_v63  ;;  %429 = vmatpush1.msra.mxu1 %v342_v22  ;;  %v382_v59 = vld [vmem:[#allocation4 + $0x190] sm:$0xff]  ;;  %v381_v60 = vld [vmem:[#allocation4 + $0x188] sm:$0xff]  ;;  %v380_v61 = vld [vmem:[#allocation4 + $0x180] sm:$0xff] }
  0x5e   :  { %229 = vmatpush2.msra.mxu0 %v145_v1  ;;  %430 = vmatprep.subr.mxu1 %v341_v24  ;;  %v379_v62 = vld [vmem:[#allocation4 + $0x178] sm:$0xff]  ;;  %v378_v63 = vld [vmem:[#allocation4 + $0x170] sm:$0xff]  ;;  %v377_v0 = vld [vmem:[#allocation4 + $0x168] sm:$0xff] }
  0x5f   :  { %230 = vmatprep.subr.mxu0 %v144_v3  ;;  %431 = vmatpush1.msra.mxu1 %v340_v26  ;;  %v376_v1 = vld [vmem:[#allocation4 + $0x160] sm:$0xff]  ;;  %v375_v2 = vld [vmem:[#allocation4 + $0x158] sm:$0xff]  ;;  %v374_v3 = vld [vmem:[#allocation4 + $0x150] sm:$0xff] }
  0x60   :  { %231 = vmatpush2.msra.mxu0 %v143_v5  ;;  %432 = vmatprep.subr.mxu1 %v339_v28  ;;  %v373_v4 = vld [vmem:[#allocation4 + $0x148] sm:$0xff]  ;;  %v372_v5 = vld [vmem:[#allocation4 + $0x140] sm:$0xff]  ;;  %v370_v7 = vld [vmem:[#allocation4 + $0x130] sm:$0xff] }
  0x61   :  { %232 = vmatprep.subr.mxu0 %v142_v6  ;;  %433 = vmatpush1.msra.mxu1 %v338_v30  ;;  %v371_v6 = vld [vmem:[#allocation4 + $0x138] sm:$0xff]  ;;  %v365_v12 = vld [vmem:[#allocation4 + $0x108] sm:$0xff]  ;;  %v364_v13 = vld [vmem:[#allocation4 + $0x100] sm:$0xff] }
  0x62   :  { %233 = vmatpush2.msra.mxu0 %v141_v8  ;;  %434 = vmatprep.subr.mxu1 %v337_v32  ;;  %v369_v8 = vld [vmem:[#allocation4 + $0x128] sm:$0xff]  ;;  %v367_v10 = vld [vmem:[#allocation4 + $0x118] sm:$0xff]  ;;  %v539_v14 = vld [vmem:[#allocation6 + $0x1c0] sm:$0xff] }
  0x63   :  { %234 = vmatprep.subr.mxu0 %v140_v9  ;;  %435 = vmatpush1.msra.mxu1 %v336_v34  ;;  %v368_v9 = vld [vmem:[#allocation4 + $0x120] sm:$0xff]  ;;  %v2704_v16 = vld [vmem:[#allocation6 + $0x1c8] sm:$0xff] }
  0x64   :  { %235 = vmatpush2.msra.mxu0 %v139_v11  ;;  %436 = vmatprep.subr.mxu1 %v335_v36  ;;  %v366_v11 = vld [vmem:[#allocation4 + $0x110] sm:$0xff]  ;;  %v531_v20 = vld [vmem:[#allocation6 + $0x180] sm:$0xff] }
  0x65   :  { %236 = vmatprep.subr.mxu0 %v138_v15  ;;  %437 = vmatpush1.msra.mxu1 %v334_v38  ;;  %v543_v15 = vld [vmem:[#allocation6 + $0x1e0] sm:$0xff] }
  0x66   :  { %237 = vmatpush2.msra.mxu0 %v137_v17  ;;  %438 = vmatprep.subr.mxu1 %v333_v40  ;;  %v2232_v17 = vcombine.low %v539_v14, %v543_v15  ;;  %v2233_v18 = vcombine.high %v539_v14, %v543_v15  ;;  %v523_v26 = vld [vmem:[#allocation6 + $0x140] sm:$0xff] }
  0x67   :  { %238 = vmatprep.subr.mxu0 %v136_v19  ;;  %439 = vmatpush1.msra.mxu1 %v332_v42  ;;  %v2706_v19 = vld [vmem:[#allocation6 + $0x1e8] sm:$0xff]  ;;  %v515_v30 = vld [vmem:[#allocation6 + $0x100] sm:$0xff] }
  0x68   :  { %239 = vmatpush2.msra.mxu0 %v135_v21  ;;  %440 = vmatprep.subr.mxu1 %v395_v44  ;;  %v535_v21 = vld [vmem:[#allocation6 + $0x1a0] sm:$0xff]  ;;  %v2234_v22 = vcombine.low %v2704_v16, %v2706_v19 }
  0x69   :  { %240 = vmatprep.subr.mxu0 %v134_v23  ;;  %441 = vmatpush2.msra.mxu1 %v394_v46  ;;  %v2235_v23 = vcombine.high %v2704_v16, %v2706_v19  ;;  %v2225_v24 = vcombine.high %v531_v20, %v535_v21  ;;  %v507_v34 = vld [vmem:[#allocation6 + $0xc0] sm:$0xff] }
  0x6a   :  { %241 = vmatpush2.msra.mxu0 %v133_v25  ;;  %442 = vmatprep.subr.mxu1 %v393_v48  ;;  %v2224_v25 = vcombine.low %v531_v20, %v535_v21  ;;  %v499_v38 = vld [vmem:[#allocation6 + $0x80] sm:$0xff] }
  0x6b   :  { %242 = vmatprep.subr.mxu0 %v132_v27  ;;  %443 = vmatpush2.msra.mxu1 %v392_v49  ;;  %v527_v27 = vld [vmem:[#allocation6 + $0x160] sm:$0xff] }
  0x6c   :  { %243 = vmatpush2.msra.mxu0 %v131_v29  ;;  %444 = vmatprep.subr.mxu1 %v391_v50  ;;  %v2217_v28 = vcombine.high %v523_v26, %v527_v27  ;;  %v2216_v29 = vcombine.low %v523_v26, %v527_v27  ;;  %v491_v42 = vld [vmem:[#allocation6 + $0x40] sm:$0xff] }
  0x6d   :  { %244 = vmatprep.subr.mxu0 %v130_v31  ;;  %445 = vmatpush2.msra.mxu1 %v390_v51  ;;  %v519_v31 = vld [vmem:[#allocation6 + $0x120] sm:$0xff] }
  0x6e   :  { %245 = vmatpush2.msra.mxu0 %v129_v33  ;;  %446 = vmatprep.subr.mxu1 %v389_v52  ;;  %v2209_v32 = vcombine.high %v515_v30, %v519_v31  ;;  %v2208_v33 = vcombine.low %v515_v30, %v519_v31  ;;  %v483_v46 = vld [vmem:[#allocation6] sm:$0xff] }
  0x6f   :  { %246 = vmatprep.subr.mxu0 %v128_v35  ;;  %447 = vmatpush2.msra.mxu1 %v388_v53  ;;  %v511_v35 = vld [vmem:[#allocation6 + $0xe0] sm:$0xff] }
  0x70   :  { %247 = vmatpush2.msra.mxu0 %v127_v37  ;;  %448 = vmatprep.subr.mxu1 %v387_v54  ;;  %v2201_v36 = vcombine.high %v507_v34, %v511_v35  ;;  %v2200_v37 = vcombine.low %v507_v34, %v511_v35  ;;  %v603_v50 = vld [vmem:[#allocation6 + $0x3c0] sm:$0xff]  ;;  %v528_v34 = vld [vmem:[#allocation6 + $0x168] sm:$0xff] }
  0x71   :  { %248 = vmatprep.subr.mxu0 %v126_v39  ;;  %449 = vmatpush2.msra.mxu1 %v386_v55  ;;  %v503_v39 = vld [vmem:[#allocation6 + $0xa0] sm:$0xff] }
  0x72   :  { %249 = vmatpush2.msra.mxu0 %v125_v41  ;;  %450 = vmatprep.subr.mxu1 %v385_v56  ;;  %v2193_v40 = vcombine.high %v499_v38, %v503_v39  ;;  %v2192_v41 = vcombine.low %v499_v38, %v503_v39  ;;  %v607_v51 = vld [vmem:[#allocation6 + $0x3e0] sm:$0xff]  ;;  %v520_v38 = vld [vmem:[#allocation6 + $0x128] sm:$0xff] }
  0x73   :  { %250 = vmatprep.subr.mxu0 %v124_v43  ;;  %451 = vmatpush2.msra.mxu1 %v384_v57  ;;  %v495_v43 = vld [vmem:[#allocation6 + $0x60] sm:$0xff]  ;;  %v2297_v52 = vcombine.high %v603_v50, %v607_v51  ;;  %v2296_v53 = vcombine.low %v603_v50, %v607_v51  ;;  %v484_v50 = vld [vmem:[#allocation6 + $0x8] sm:$0xff] }
  0x74   :  { %251 = vmatpush2.msra.mxu0 %v123_v45  ;;  %452 = vmatprep.subr.mxu1 %v383_v58  ;;  %v2185_v44 = vcombine.high %v491_v42, %v495_v43  ;;  %v2184_v45 = vcombine.low %v491_v42, %v495_v43  ;;  %v595_v54 = vld [vmem:[#allocation6 + $0x380] sm:$0xff]  ;;  %v512_v42 = vld [vmem:[#allocation6 + $0xe8] sm:$0xff] }
  0x75   :  { %253 = vmatmul.mubr.f32.vlgmr.msra.gmra.mxu0 %v88_v47  ;;  %453 = vmatpush2.msra.mxu1 %v382_v59  ;;  %v487_v47 = vld [vmem:[#allocation6 + $0x20] sm:$0xff]  ;;  %v488_v51 = vld [vmem:[#allocation6 + $0x28] sm:$0xff] }
  0x76   :  { %454 = vmatprep.subr.mxu1 %v381_v60  ;;  %1293 = vmatprep.subr.bf16.mxu0 %v2233_v18  ;;  %v2177_v48 = vcombine.high %v483_v46, %v487_v47  ;;  %v2176_v49 = vcombine.low %v483_v46, %v487_v47  ;;  %v599_v55 = vld [vmem:[#allocation6 + $0x3a0] sm:$0xff]  ;;  %v504_v46 = vld [vmem:[#allocation6 + $0xa8] sm:$0xff] }
  0x77   :  { %455 = vmatpush2.msra.mxu1 %v380_v61  ;;  %1294 = vmatpush1.bf16.msra.mxu0 %v2232_v17  ;;  %v2289_v56 = vcombine.high %v595_v54, %v599_v55  ;;  %v2288_v57 = vcombine.low %v595_v54, %v599_v55  ;;  %v587_v58 = vld [vmem:[#allocation6 + $0x340] sm:$0xff]  ;;  %v496_v47 = vld [vmem:[#allocation6 + $0x68] sm:$0xff] }
  0x78   :  { %456 = vmatprep.subr.mxu1 %v379_v62  ;;  %1295 = vmatprep.subr.bf16.mxu0 %v2225_v24  ;;  %v591_v59 = vld [vmem:[#allocation6 + $0x360] sm:$0xff]  ;;  %v604_v54 = vld [vmem:[#allocation6 + $0x3c8] sm:$0xff] }
  0x79   :  { %457 = vmatpush2.msra.mxu1 %v378_v63  ;;  %v2281_v60 = vcombine.high %v587_v58, %v591_v59  ;;  %v2280_v61 = vcombine.low %v587_v58, %v591_v59  ;;  %v579_v62 = vld [vmem:[#allocation6 + $0x300] sm:$0xff]  ;;  %v608_v55 = vld [vmem:[#allocation6 + $0x3e8] sm:$0xff] }
  0x7a   :  { %458 = vmatprep.subr.mxu1 %v377_v0  ;;  %v583_v63 = vld [vmem:[#allocation6 + $0x320] sm:$0xff]  ;;  %v596_v58 = vld [vmem:[#allocation6 + $0x388] sm:$0xff] }
  0x7b   :  { %459 = vmatpush2.msra.mxu1 %v376_v1  ;;  %1296 = vmatpush1.bf16.msra.mxu0 %v2224_v25  ;;  %v2273_v0 = vcombine.high %v579_v62, %v583_v63  ;;  %v2272_v1 = vcombine.low %v579_v62, %v583_v63  ;;  %v600_v59 = vld [vmem:[#allocation6 + $0x3a8] sm:$0xff] }
  0x7c   :  { %460 = vmatprep.subr.mxu1 %v375_v2  ;;  %1297 = vmatprep.subr.bf16.mxu0 %v2217_v28  ;;  %v571_v2 = vld [vmem:[#allocation6 + $0x2c0] sm:$0xff]  ;;  %v532_v28 = vld [vmem:[#allocation6 + $0x188] sm:$0xff] }
  0x7d   :  { %461 = vmatpush2.msra.mxu1 %v374_v3  ;;  %v575_v3 = vld [vmem:[#allocation6 + $0x2e0] sm:$0xff]  ;;  %v588_v62 = vld [vmem:[#allocation6 + $0x348] sm:$0xff] }
  0x7e   :  { %462 = vmatprep.subr.mxu1 %v373_v4  ;;  %v2265_v4 = vcombine.high %v571_v2, %v575_v3  ;;  %v592_v63 = vld [vmem:[#allocation6 + $0x368] sm:$0xff] }
  0x7f   :  { %463 = vmatpush2.msra.mxu1 %v372_v5  ;;  %1298 = vmatpush1.bf16.msra.mxu0 %v2216_v29  ;;  %v2264_v5 = vcombine.low %v571_v2, %v575_v3  ;;  %v536_v29 = vld [vmem:[#allocation6 + $0x1a8] sm:$0xff] }
  0x80   :  { %464 = vmatprep.subr.mxu1 %v371_v6  ;;  %1299 = vmatprep.subr.bf16.mxu0 %v2209_v32  ;;  %v563_v6 = vld [vmem:[#allocation6 + $0x280] sm:$0xff]  ;;  %v2227_v32 = vcombine.high %v532_v28, %v536_v29  ;;  %v2226_v35 = vcombine.low %v532_v28, %v536_v29  ;;  %v580_v2 = vld [vmem:[#allocation6 + $0x308] sm:$0xff] }
  0x81   :  { %465 = vmatpush2.msra.mxu1 %v370_v7  ;;  %v567_v7 = vld [vmem:[#allocation6 + $0x2a0] sm:$0xff]  ;;  %v584_v3 = vld [vmem:[#allocation6 + $0x328] sm:$0xff] }
  0x82   :  { %466 = vmatprep.subr.mxu1 %v369_v8  ;;  %v2257_v8 = vcombine.high %v563_v6, %v567_v7 }
  0x83   :  { %467 = vmatpush2.msra.mxu1 %v368_v9  ;;  %1300 = vmatpush1.bf16.msra.mxu0 %v2208_v33  ;;  %v2256_v9 = vcombine.low %v563_v6, %v567_v7  ;;  %v524_v33 = vld [vmem:[#allocation6 + $0x148] sm:$0xff] }
  0x84   :  { %468 = vmatprep.subr.mxu1 %v367_v10  ;;  %1301 = vmatprep.subr.bf16.mxu0 %v2201_v36  ;;  %v167_v10 = vlaneseq  ;;  %v2219_v36 = vcombine.high %v524_v33, %v528_v34  ;;  %v2218_v39 = vcombine.low %v524_v33, %v528_v34  ;;  %v572_v6 = vld [vmem:[#allocation6 + $0x2c8] sm:$0xff] }
  0x85   :  { %469 = vmatpush2.msra.mxu1 %v366_v11  ;;  %v576_v7 = vld [vmem:[#allocation6 + $0x2e8] sm:$0xff] }
  0x86   :  { %470 = vmatprep.subr.mxu1 %v365_v12  ;;  %v2713_v11 = vshrl.u32 %v167_v10, 7  ;;  %v552_v34 = vld [vmem:[#allocation6 + $0x228] sm:$0xff] }
  0x87   :  { %471 = vmatpush2.msra.mxu1 %v364_v13  ;;  %1302 = vmatpush1.bf16.msra.mxu0 %v2200_v37  ;;  %v165_v13 = vld [vmem:[%s2770_s2] sm:$0x3]  ;;  %v516_v37 = vld [vmem:[#allocation6 + $0x108] sm:$0xff] }
  0x88   :  { %1334 = vmatprep.subr.bf16.mxu1 %v2235_v23  ;;  %1303 = vmatprep.subr.bf16.mxu0 %v2193_v40  ;;  %v2716_v12 = vsub.s32 0, %v2713_v11  ;;  %v2722_v14 = vsub.s32 1, %v2713_v11  ;;  %v2211_v40 = vcombine.high %v516_v37, %v520_v38  ;;  %v2210_v43 = vcombine.low %v516_v37, %v520_v38  ;;  %v541_v38 = vld [vmem:[#allocation6 + $0x1d0] sm:$0xff] }
  0x8a   :  { %v170_v15 = vrot.slane %v165_v13, %v2716_v12  ;;  %v174_v17 = vrot.slane %v165_v13, %v2722_v14  ;;  %v564_v13 = vld [vmem:[#allocation6 + $0x288] sm:$0xff] }
  0x8b   :  { %1304 = vmatpush1.bf16.msra.mxu0 %v2192_v41  ;;  %v508_v41 = vld [vmem:[#allocation6 + $0xc8] sm:$0xff] }
  0x8c   :  { %1305 = vmatprep.subr.bf16.mxu0 %v2185_v44  ;;  %v2203_v44 = vcombine.high %v508_v41, %v512_v42  ;;  %v2202_v16 = vcombine.low %v508_v41, %v512_v42  ;;  %v546_v42 = vld [vmem:[#allocation6 + $0x1f8] sm:$0xff] }
  0x8f   :  { %1306 = vmatpush1.bf16.msra.mxu0 %v2184_v45  ;;  %v500_v45 = vld [vmem:[#allocation6 + $0x88] sm:$0xff] }
  0x90   :  { %1307 = vmatprep.subr.bf16.mxu0 %v2177_v48  ;;  %v2195_v19 = vcombine.high %v500_v45, %v504_v46  ;;  %v2194_v48 = vcombine.low %v500_v45, %v504_v46  ;;  %v396_v46 = vld [vmem:[%s2772_s4] sm:$0x3] }
  0x93   :  { %1308 = vmatpush1.bf16.msra.mxu0 %v2176_v49 }
  0x94   :  { %1309 = vmatprep.subr.bf16.mxu0 %v2297_v52 }
  0x97   :  { %1310 = vmatpush2.bf16.msra.mxu0 %v2296_v53  ;;  %v2179_v53 = vcombine.high %v484_v50, %v488_v51 }
  0x98   :  { %1311 = vmatprep.subr.bf16.mxu0 %v2289_v56  ;;  %v2178_v56 = vcombine.low %v484_v50, %v488_v51 }
  0x9b   :  { %1312 = vmatpush2.bf16.msra.mxu0 %v2288_v57  ;;  %v2299_v57 = vcombine.high %v604_v54, %v608_v55 }
  0x9c   :  { %1313 = vmatprep.subr.bf16.mxu0 %v2281_v60  ;;  %v2298_v60 = vcombine.low %v604_v54, %v608_v55  ;;  %v534_v54 = vld [vmem:[#allocation6 + $0x198] sm:$0xff] }
  0x9d   :  { %v538_v55 = vld [vmem:[#allocation6 + $0x1b8] sm:$0xff] }
  0x9f   :  { %1314 = vmatpush2.bf16.msra.mxu0 %v2280_v61  ;;  %v2291_v61 = vcombine.high %v596_v58, %v600_v59 }
  0xa0   :  { %1315 = vmatprep.subr.bf16.mxu0 %v2273_v0  ;;  %v2290_v0 = vcombine.low %v596_v58, %v600_v59  ;;  %v525_v58 = vld [vmem:[#allocation6 + $0x150] sm:$0xff] }
  0xa3   :  { %1316 = vmatpush2.bf16.msra.mxu0 %v2272_v1  ;;  %v2283_v1 = vcombine.high %v588_v62, %v592_v63 }
  0xa4   :  { %1317 = vmatprep.subr.bf16.mxu0 %v2265_v4  ;;  %v2282_v4 = vcombine.low %v588_v62, %v592_v63  ;;  %v526_v62 = vld [vmem:[#allocation6 + $0x158] sm:$0xff] }
  0xa5   :  { %v530_v63 = vld [vmem:[#allocation6 + $0x178] sm:$0xff] }
  0xa7   :  { %1318 = vmatpush2.bf16.msra.mxu0 %v2264_v5  ;;  %v2275_v5 = vcombine.high %v580_v2, %v584_v3 }
  0xa8   :  { %1319 = vmatprep.subr.bf16.mxu0 %v2257_v8  ;;  %v2274_v8 = vcombine.low %v580_v2, %v584_v3  ;;  %v2223_v3 = vcombine.high %v526_v62, %v530_v63 }
  0xab   :  { %1320 = vmatpush2.bf16.msra.mxu0 %v2256_v9  ;;  %v2267_v9 = vcombine.high %v572_v6, %v576_v7 }
 0x107   :  { %v325_v20 = vpop.f32.mrf.mxu1 }
 0x109   :  { %v327_v26 = vpop.f32.mrf.mxu1 }
 0x135   :  { %v254_v18 = vpop.f32.mrf.mxu0 }
 0x136   :  { %v255_v21 = vadd.f32 %v254_v18, %v170_v15  ;;  %v568_v15 = vld [vmem:[#allocation6 + $0x2a8] sm:$0xff] }
 0x137   :  { %v256_v23 = vpop.f32.mrf.mxu0  ;;  %v2259_v18 = vcombine.high %v564_v13, %v568_v15 }
 0x138   :  { %v257_v24 = vadd.f32 %v256_v23, %v174_v17  ;;  %v326_v25 = vadd.f32 %v325_v20, %v255_v21  ;;  %v2266_v17 = vcombine.low %v572_v6, %v576_v7  ;;  %v2258_v20 = vcombine.low %v564_v13, %v568_v15  ;;  %v555_v21 = vld [vmem:[#allocation6 + $0x240] sm:$0xff]  ;;  %v518_v6 = vld [vmem:[#allocation6 + $0x118] sm:$0xff] }
 0x139   :  { %v559_v23 = vld [vmem:[#allocation6 + $0x260] sm:$0xff]  ;;  %v522_v7 = vld [vmem:[#allocation6 + $0x138] sm:$0xff] }
 0x13a   :  { %v328_v27 = vadd.f32 %v327_v26, %v257_v24  ;;  %v330_v31 = vmax.f32 %v326_v25, 0.0  ;;  %v556_v24 = vld [vmem:[#allocation6 + $0x248] sm:$0xff]  ;;  %v2249_v25 = vcombine.high %v555_v21, %v559_v23  ;;  %v2215_v15 = vcombine.high %v518_v6, %v522_v7 }
 0x13b   :  { %v560_v26 = vld [vmem:[#allocation6 + $0x268] sm:$0xff] }
 0x13c   :  { %v331_v30 = vmax.f32 %v328_v27, 0.0  ;;  %v2248_v27 = vcombine.low %v555_v21, %v559_v23  ;;  %v2250_v28 = vcombine.low %v556_v24, %v560_v26  ;;  %v2251_v29 = vcombine.high %v556_v24, %v560_v26  ;;  %1321 = vmatprep.subr.bf16.mxu0 %v2249_v25  ;;  %v514_v21 = vld [vmem:[#allocation6 + $0xf8] sm:$0xff] }
 0x13d   :  { %v2214_v24 = vcombine.low %v518_v6, %v522_v7 }
 0x13e   :  { %472 = vmatprep.mubr.f32.mxu1 %v331_v30  ;;  %1322 = vmatpush2.bf16.msra.mxu0 %v2248_v27  ;;  %v547_v30 = vld [vmem:[#allocation6 + $0x200] sm:$0xff]  ;;  %v501_v27 = vld [vmem:[#allocation6 + $0x90] sm:$0xff] }
 0x13f   :  { %473 = vmatmul.mubr.f32.vlgmr.msra.gmra.mxu1 %v330_v31  ;;  %v551_v31 = vld [vmem:[#allocation6 + $0x220] sm:$0xff] }
 0x140   :  { %1335 = vmatpush1.bf16.msra.mxu1 %v2234_v22  ;;  %v492_v22 = vld [vmem:[#allocation6 + $0x48] sm:$0xff]  ;;  %v2241_v33 = vcombine.high %v547_v30, %v551_v31 }
 0x141   :  { %1336 = vmatprep.subr.bf16.mxu1 %v2227_v32  ;;  %v2187_v49 = vcombine.high %v492_v22, %v496_v47  ;;  %v2186_v52 = vcombine.low %v492_v22, %v496_v47  ;;  %v548_v32 = vld [vmem:[#allocation6 + $0x208] sm:$0xff] }
 0x142   :  { %v2243_v37 = vcombine.high %v548_v32, %v552_v34  ;;  %1323 = vmatprep.subr.bf16.mxu0 %v2241_v33 }
 0x144   :  { %1337 = vmatpush1.bf16.msra.mxu1 %v2226_v35  ;;  %v2240_v35 = vcombine.low %v547_v30, %v551_v31  ;;  %v506_v30 = vld [vmem:[#allocation6 + $0xb8] sm:$0xff] }
 0x145   :  { %1338 = vmatprep.subr.bf16.mxu1 %v2219_v36  ;;  %v2242_v36 = vcombine.low %v548_v32, %v552_v34 }
 0x146   :  { %1324 = vmatpush2.bf16.msra.mxu0 %v2240_v35  ;;  %v493_v35 = vld [vmem:[#allocation6 + $0x50] sm:$0xff] }
 0x148   :  { %1339 = vmatpush1.bf16.msra.mxu1 %v2218_v39  ;;  %v545_v39 = vld [vmem:[#allocation6 + $0x1f0] sm:$0xff] }
 0x149   :  { %1340 = vmatprep.subr.bf16.mxu1 %v2211_v40  ;;  %v542_v40 = vld [vmem:[#allocation6 + $0x1d8] sm:$0xff]  ;;  %v2237_v41 = vcombine.high %v541_v38, %v545_v39 }
 0x14a   :  { %v2239_v45 = vcombine.high %v542_v40, %v546_v42 }
 0x14b   :  { %1375 = vmatprep.subr.bf16.mxu0 %v2237_v41 }
 0x14c   :  { %1341 = vmatpush1.bf16.msra.mxu1 %v2210_v43  ;;  %v2236_v43 = vcombine.low %v541_v38, %v545_v39  ;;  %v498_v38 = vld [vmem:[#allocation6 + $0x78] sm:$0xff] }
 0x14d   :  { %1342 = vmatprep.subr.bf16.mxu1 %v2203_v44  ;;  %v2238_v44 = vcombine.low %v542_v40, %v546_v42 }
 0x150   :  { %1343 = vmatpush1.bf16.msra.mxu1 %v2202_v16  ;;  %v401_v16 = vrot.slane %v396_v46, %v2716_v12 }
 0x151   :  { %1344 = vmatprep.subr.bf16.mxu1 %v2195_v19  ;;  %v405_v19 = vrot.slane %v396_v46, %v2722_v14  ;;  %v490_v46 = vld [vmem:[#allocation6 + $0x38] sm:$0xff] }
 0x154   :  { %1345 = vmatpush1.bf16.msra.mxu1 %v2194_v48 }
 0x155   :  { %1346 = vmatprep.subr.bf16.mxu1 %v2187_v49 }
 0x158   :  { %1347 = vmatpush1.bf16.msra.mxu1 %v2186_v52  ;;  %v533_v52 = vld [vmem:[#allocation6 + $0x190] sm:$0xff] }
 0x159   :  { %1348 = vmatprep.subr.bf16.mxu1 %v2179_v53  ;;  %v537_v53 = vld [vmem:[#allocation6 + $0x1b0] sm:$0xff] }
 0x15a   :  { %v2229_v59 = vcombine.high %v533_v52, %v537_v53 }
 0x15c   :  { %1349 = vmatpush1.bf16.msra.mxu1 %v2178_v56 }
 0x15d   :  { %1350 = vmatprep.subr.bf16.mxu1 %v2299_v57 }
 0x160   :  { %1351 = vmatpush2.bf16.msra.mxu1 %v2298_v60  ;;  %v2231_v60 = vcombine.high %v534_v54, %v538_v55 }
 0x161   :  { %1352 = vmatprep.subr.bf16.mxu1 %v2291_v61  ;;  %v529_v61 = vld [vmem:[#allocation6 + $0x170] sm:$0xff] }
 0x162   :  { %v2221_v2 = vcombine.high %v525_v58, %v529_v61 }
 0x164   :  { %1353 = vmatpush2.bf16.msra.mxu1 %v2290_v0  ;;  %v2228_v0 = vcombine.low %v533_v52, %v537_v53 }
 0x165   :  { %1354 = vmatprep.subr.bf16.mxu1 %v2283_v1  ;;  %v2230_v1 = vcombine.low %v534_v54, %v538_v55 }
 0x168   :  { %1355 = vmatpush2.bf16.msra.mxu1 %v2282_v4  ;;  %v517_v4 = vld [vmem:[#allocation6 + $0x110] sm:$0xff] }
 0x169   :  { %1356 = vmatprep.subr.bf16.mxu1 %v2275_v5  ;;  %v521_v5 = vld [vmem:[#allocation6 + $0x130] sm:$0xff] }
 0x16a   :  { %v2213_v13 = vcombine.high %v517_v4, %v521_v5  ;;  %v2212_v23 = vcombine.low %v517_v4, %v521_v5  ;;  %v594_v4 = vld [vmem:[#allocation6 + $0x378] sm:$0xff] }
 0x16c   :  { %1357 = vmatpush2.bf16.msra.mxu1 %v2274_v8  ;;  %v2220_v8 = vcombine.low %v525_v58, %v529_v61  ;;  %v601_v58 = vld [vmem:[#allocation6 + $0x3b0] sm:$0xff] }
 0x16d   :  { %1358 = vmatprep.subr.bf16.mxu1 %v2267_v9  ;;  %v2222_v9 = vcombine.low %v526_v62, %v530_v63 }
 0x170   :  { %1359 = vmatpush2.bf16.msra.mxu1 %v2266_v17  ;;  %v509_v17 = vld [vmem:[#allocation6 + $0xd0] sm:$0xff] }
 0x171   :  { %1360 = vmatprep.subr.bf16.mxu1 %v2259_v18  ;;  %v513_v18 = vld [vmem:[#allocation6 + $0xf0] sm:$0xff] }
 0x172   :  { %v2205_v25 = vcombine.high %v509_v17, %v513_v18  ;;  %v2204_v31 = vcombine.low %v509_v17, %v513_v18  ;;  %v586_v17 = vld [vmem:[#allocation6 + $0x338] sm:$0xff] }
 0x174   :  { %1361 = vmatpush2.bf16.msra.mxu1 %v2258_v20  ;;  %v510_v20 = vld [vmem:[#allocation6 + $0xd8] sm:$0xff] }
 0x175   :  { %1362 = vmatprep.subr.bf16.mxu1 %v2251_v29  ;;  %v2207_v26 = vcombine.high %v510_v20, %v514_v21  ;;  %v502_v29 = vld [vmem:[#allocation6 + $0x98] sm:$0xff]  ;;  %v2206_v32 = vcombine.low %v510_v20, %v514_v21 }
 0x176   :  { %v2199_v34 = vcombine.high %v502_v29, %v506_v30  ;;  %v2198_v40 = vcombine.low %v502_v29, %v506_v30 }
 0x178   :  { %1363 = vmatpush2.bf16.msra.mxu1 %v2250_v28  ;;  %v505_v28 = vld [vmem:[#allocation6 + $0xb0] sm:$0xff] }
 0x179   :  { %1364 = vmatprep.subr.bf16.mxu1 %v2243_v37  ;;  %v2197_v33 = vcombine.high %v501_v27, %v505_v28  ;;  %v494_v37 = vld [vmem:[#allocation6 + $0x58] sm:$0xff]  ;;  %v2196_v39 = vcombine.low %v501_v27, %v505_v28 }
 0x17a   :  { %v2191_v42 = vcombine.high %v494_v37, %v498_v38  ;;  %v578_v27 = vld [vmem:[#allocation6 + $0x2f8] sm:$0xff] }
 0x17c   :  { %1365 = vmatpush2.bf16.msra.mxu1 %v2242_v36  ;;  %v497_v36 = vld [vmem:[#allocation6 + $0x70] sm:$0xff] }
 0x17d   :  { %1416 = vmatprep.subr.bf16.mxu1 %v2239_v45  ;;  %v2189_v41 = vcombine.high %v493_v35, %v497_v36  ;;  %v486_v45 = vld [vmem:[#allocation6 + $0x18] sm:$0xff] }
 0x17e   :  { %v2182_v53 = vcombine.low %v486_v45, %v490_v46 }
 0x1ff   :  { %v474_v22 = vpop.f32.mrf.mxu1 }
 0x200   :  { %v475_v47 = vadd.f32 %v474_v22, %v401_v16  ;;  %v2188_v16 = vcombine.low %v493_v35, %v497_v36  ;;  %v570_v35 = vld [vmem:[#allocation6 + $0x2b8] sm:$0xff] }
 0x201   :  { %v476_v48 = vpop.f32.mrf.mxu1 }
 0x202   :  { %v477_v49 = vadd.f32 %v476_v48, %v405_v19  ;;  %v479_v50 = vmax.f32 %v475_v47, 0.0  ;;  %v2190_v19 = vcombine.low %v494_v37, %v498_v38  ;;  %v2183_v47 = vcombine.high %v486_v45, %v490_v46  ;;  %v605_v48 = vld [vmem:[#allocation6 + $0x3d0] sm:$0xff] }
 0x204   :  { %v480_v51 = vmax.f32 %v477_v49, 0.0  ;;  %v2734_v57 = vpack.c.bf16 %v479_v50, %v479_v50  ;;  %v609_v49 = vld [vmem:[#allocation6 + $0x3f0] sm:$0xff]  ;;  %v606_v50 = vld [vmem:[#allocation6 + $0x3d8] sm:$0xff] }
 0x205   :  { %v2301_v54 = vcombine.high %v605_v48, %v609_v49  ;;  %v2300_v61 = vcombine.low %v605_v48, %v609_v49  ;;  %v554_v48 = vld [vmem:[#allocation6 + $0x238] sm:$0xff] }
 0x206   :  { %v482_v56 = vpack.c.bf16 %v480_v51, %v480_v51  ;;  %v610_v51 = vld [vmem:[#allocation6 + $0x3f8] sm:$0xff] }
 0x207   :  { %v2303_v55 = vcombine.high %v606_v50, %v610_v51  ;;  %v2302_v62 = vcombine.low %v606_v50, %v610_v51 }
 0x208   :  { %1325 = vmatprep.mubr.bf16.mxu0 %v482_v56  ;;  %1366 = vmatprep.mubr.bf16.mxu1 %v482_v56 }
 0x209   :  { %1326 = vmatmul.mubr.bf16.vlgmr.msra.gmra.mxu0 %v2734_v57  ;;  %1367 = vmatmul.mubr.bf16.vlgmr.msra.gmra.mxu1 %v2734_v57 }
 0x20a   :  { %1376 = vmatpush1.bf16.msra.mxu0 %v2236_v43  ;;  %1417 = vmatpush1.bf16.msra.mxu1 %v2238_v44  ;;  %v485_v43 = vld [vmem:[#allocation6 + $0x10] sm:$0xff] }
 0x20b   :  { %1407 = vmatprep.mubr.bf16.mxu0 %v482_v56  ;;  %1448 = vmatprep.mubr.bf16.mxu1 %v482_v56  ;;  %v489_v44 = vld [vmem:[#allocation6 + $0x30] sm:$0xff] }
 0x20c   :  { %1377 = vmatprep.subr.bf16.mxu0 %v2229_v59  ;;  %1418 = vmatprep.subr.bf16.mxu1 %v2231_v60  ;;  %v2181_v22 = vcombine.high %v485_v43, %v489_v44  ;;  %v2180_v52 = vcombine.low %v485_v43, %v489_v44  ;;  %v597_v56 = vld [vmem:[#allocation6 + $0x390] sm:$0xff]  ;;  %v598_v59 = vld [vmem:[#allocation6 + $0x398] sm:$0xff] }
 0x20d   :  { %v602_v60 = vld [vmem:[#allocation6 + $0x3b8] sm:$0xff]  ;;  %v2293_v63 = vcombine.high %v597_v56, %v601_v58  ;;  %v2292_v5 = vcombine.low %v597_v56, %v601_v58 }
 0x20e   :  { %1378 = vmatpush1.bf16.msra.mxu0 %v2228_v0  ;;  %1419 = vmatpush1.bf16.msra.mxu1 %v2230_v1  ;;  %v2295_v0 = vcombine.high %v598_v59, %v602_v60  ;;  %v589_v1 = vld [vmem:[#allocation6 + $0x350] sm:$0xff]  ;;  %v2294_v6 = vcombine.low %v598_v59, %v602_v60  ;;  %v562_v43 = vld [vmem:[#allocation6 + $0x278] sm:$0xff] }
 0x20f   :  { %1379 = vmatprep.subr.bf16.mxu0 %v2221_v2  ;;  %1420 = vmatprep.subr.bf16.mxu1 %v2223_v3  ;;  %v593_v2 = vld [vmem:[#allocation6 + $0x370] sm:$0xff]  ;;  %v590_v3 = vld [vmem:[#allocation6 + $0x358] sm:$0xff] }
 0x210   :  { %v2285_v7 = vcombine.high %v589_v1, %v593_v2  ;;  %v2284_v18 = vcombine.low %v589_v1, %v593_v2  ;;  %v2286_v20 = vcombine.low %v590_v3, %v594_v4  ;;  %v2469_v56 = vld [vmem:[#allocation7 + $0xf8] sm:$0xff]   ;;  %v2472_v60 = vld [vmem:[#allocation7 + $0x70] sm:$0xff]   ;;  %v2477_v1 = vld [vmem:[#allocation7 + $0xe8] sm:$0xff]  }
 0x211   :  { %v2470_v58 = vld [vmem:[#allocation7 + $0x38] sm:$0xff]   ;;  %v2478_v2 = vld [vmem:[#allocation7 + $0x28] sm:$0xff]  }
 0x212   :  { %1380 = vmatpush1.bf16.msra.mxu0 %v2220_v8  ;;  %1421 = vmatpush1.bf16.msra.mxu1 %v2222_v9  ;;  %v2287_v8 = vcombine.high %v590_v3, %v594_v4  ;;  %v581_v9 = vld [vmem:[#allocation6 + $0x310] sm:$0xff]  ;;  %v2471_v59 = vld [vmem:[#allocation7 + $0xb8] sm:$0xff]   ;;  %v2479_v3 = vld [vmem:[#allocation7 + $0xa8] sm:$0xff]  }
 0x213   :  { %1381 = vmatprep.subr.bf16.mxu0 %v2213_v13  ;;  %1422 = vmatprep.subr.bf16.mxu1 %v2215_v15  ;;  %v585_v13 = vld [vmem:[#allocation6 + $0x330] sm:$0xff]  ;;  %v582_v15 = vld [vmem:[#allocation6 + $0x318] sm:$0xff]  ;;  %v2480_v4 = vld [vmem:[#allocation7 + $0x60] sm:$0xff]  }
 0x214   :  { %v2277_v21 = vcombine.high %v581_v9, %v585_v13  ;;  %v2276_v28 = vcombine.low %v581_v9, %v585_v13  ;;  %v2278_v29 = vcombine.low %v582_v15, %v586_v17  ;;  %v2486_v9 = vld [vmem:[#allocation7 + $0x18] sm:$0xff]  }
 0x215   :  { %v2487_v13 = vld [vmem:[#allocation7 + $0x98] sm:$0xff]  }
 0x216   :  { %1382 = vmatpush1.bf16.msra.mxu0 %v2212_v23  ;;  %1423 = vmatpush1.bf16.msra.mxu1 %v2214_v24  ;;  %v2279_v23 = vcombine.high %v582_v15, %v586_v17  ;;  %v573_v24 = vld [vmem:[#allocation6 + $0x2d0] sm:$0xff] }
 0x217   :  { %1383 = vmatprep.subr.bf16.mxu0 %v2205_v25  ;;  %1424 = vmatprep.subr.bf16.mxu1 %v2207_v26  ;;  %v577_v25 = vld [vmem:[#allocation6 + $0x2f0] sm:$0xff]  ;;  %v574_v26 = vld [vmem:[#allocation6 + $0x2d8] sm:$0xff] }
 0x218   :  { %v2269_v30 = vcombine.high %v573_v24, %v577_v25  ;;  %v2268_v36 = vcombine.low %v573_v24, %v577_v25  ;;  %v2270_v37 = vcombine.low %v574_v26, %v578_v27  ;;  %v2488_v15 = vld [vmem:[#allocation7 + $0x50] sm:$0xff]   ;;  %v2494_v24 = vld [vmem:[#allocation7 + $0x8] sm:$0xff]  }
 0x219   :  { %v2489_v17 = vld [vmem:[#allocation7 + $0xd0] sm:$0xff]   ;;  %v2495_v25 = vld [vmem:[#allocation7 + $0x88] sm:$0xff]  }
 0x21a   :  { %1384 = vmatpush1.bf16.msra.mxu0 %v2204_v31  ;;  %1425 = vmatpush1.bf16.msra.mxu1 %v2206_v32  ;;  %v2271_v31 = vcombine.high %v574_v26, %v578_v27  ;;  %v565_v32 = vld [vmem:[#allocation6 + $0x290] sm:$0xff]  ;;  %v2496_v26 = vld [vmem:[#allocation7 + $0x40] sm:$0xff]  }
 0x21b   :  { %1385 = vmatprep.subr.bf16.mxu0 %v2197_v33  ;;  %1426 = vmatprep.subr.bf16.mxu1 %v2199_v34  ;;  %v569_v33 = vld [vmem:[#allocation6 + $0x2b0] sm:$0xff]  ;;  %v566_v34 = vld [vmem:[#allocation6 + $0x298] sm:$0xff]  ;;  %v2497_v27 = vld [vmem:[#allocation7 + $0xc0] sm:$0xff]  }
 0x21c   :  { %v2261_v38 = vcombine.high %v565_v32, %v569_v33  ;;  %v2260_v44 = vcombine.low %v565_v32, %v569_v33  ;;  %v2262_v45 = vcombine.low %v566_v34, %v570_v35  ;;  %v623_v32 = vsub.s32 2, %v2713_v11  ;;  %v2744_v33 = vld [vmem:[%s2774_s6] sm:$0xff] }
 0x21e   :  { %1386 = vmatpush1.bf16.msra.mxu0 %v2196_v39  ;;  %1427 = vmatpush1.bf16.msra.mxu1 %v2198_v40  ;;  %v2263_v39 = vcombine.high %v566_v34, %v570_v35  ;;  %v557_v40 = vld [vmem:[#allocation6 + $0x250] sm:$0xff]  ;;  %v627_v34 = vsub.s32 3, %v2713_v11  ;;  %v616_v35 = vrot.slane %v2744_v33, %v2716_v12 }
 0x21f   :  { %1387 = vmatprep.subr.bf16.mxu0 %v2189_v41  ;;  %1428 = vmatprep.subr.bf16.mxu1 %v2191_v42  ;;  %v561_v41 = vld [vmem:[#allocation6 + $0x270] sm:$0xff]  ;;  %v558_v42 = vld [vmem:[#allocation6 + $0x258] sm:$0xff] }
 0x220   :  { %v2253_v46 = vcombine.high %v557_v40, %v561_v41  ;;  %v2252_v49 = vcombine.low %v557_v40, %v561_v41  ;;  %v2254_v50 = vcombine.low %v558_v42, %v562_v43 }
 0x222   :  { %1388 = vmatpush1.bf16.msra.mxu0 %v2188_v16  ;;  %1429 = vmatpush1.bf16.msra.mxu1 %v2190_v19  ;;  %v2255_v16 = vcombine.high %v558_v42, %v562_v43  ;;  %v549_v19 = vld [vmem:[#allocation6 + $0x210] sm:$0xff] }
 0x223   :  { %1389 = vmatprep.subr.bf16.mxu0 %v2181_v22  ;;  %1430 = vmatprep.subr.bf16.mxu1 %v2183_v47  ;;  %v553_v22 = vld [vmem:[#allocation6 + $0x230] sm:$0xff]  ;;  %v550_v47 = vld [vmem:[#allocation6 + $0x218] sm:$0xff] }
 0x224   :  { %v2245_v51 = vcombine.high %v549_v19, %v553_v22 }
 0x226   :  { %1390 = vmatpush1.bf16.msra.mxu0 %v2180_v52  ;;  %1431 = vmatpush1.bf16.msra.mxu1 %v2182_v53  ;;  %v2247_v52 = vcombine.high %v550_v47, %v554_v48  ;;  %v2244_v53 = vcombine.low %v549_v19, %v553_v22 }
 0x227   :  { %1391 = vmatprep.subr.bf16.mxu0 %v2301_v54  ;;  %1432 = vmatprep.subr.bf16.mxu1 %v2303_v55  ;;  %v2246_v54 = vcombine.low %v550_v47, %v554_v48  ;;  %v2468_v55 = vld [vmem:[#allocation7 + $0x78] sm:$0xff]  }
 0x22a   :  { %1392 = vmatpush2.bf16.msra.mxu0 %v2300_v61  ;;  %1433 = vmatpush2.bf16.msra.mxu1 %v2302_v62  ;;  %v2473_v61 = vld [vmem:[#allocation7 + $0xf0] sm:$0xff]  }
 0x22b   :  { %1393 = vmatprep.subr.bf16.mxu0 %v2293_v63  ;;  %1434 = vmatprep.subr.bf16.mxu1 %v2295_v0  ;;  %v2474_v62 = vld [vmem:[#allocation7 + $0x30] sm:$0xff]   ;;  %v2476_v0 = vld [vmem:[#allocation7 + $0x68] sm:$0xff]  }
 0x22c   :  { %v2475_v63 = vld [vmem:[#allocation7 + $0xb0] sm:$0xff]  }
 0x22e   :  { %1394 = vmatpush2.bf16.msra.mxu0 %v2292_v5  ;;  %1435 = vmatpush2.bf16.msra.mxu1 %v2294_v6  ;;  %v2481_v5 = vld [vmem:[#allocation7 + $0xe0] sm:$0xff]  }
 0x22f   :  { %1395 = vmatprep.subr.bf16.mxu0 %v2285_v7  ;;  %1436 = vmatprep.subr.bf16.mxu1 %v2287_v8  ;;  %v2482_v6 = vld [vmem:[#allocation7 + $0x20] sm:$0xff]   ;;  %v2484_v7 = vld [vmem:[#allocation7 + $0x58] sm:$0xff]  }
 0x230   :  { %v2485_v8 = vld [vmem:[#allocation7 + $0xd8] sm:$0xff]  }
 0x232   :  { %1396 = vmatpush2.bf16.msra.mxu0 %v2284_v18  ;;  %1437 = vmatpush2.bf16.msra.mxu1 %v2286_v20  ;;  %v2490_v18 = vld [vmem:[#allocation7 + $0x10] sm:$0xff]  }
 0x233   :  { %1397 = vmatprep.subr.bf16.mxu0 %v2277_v21  ;;  %1438 = vmatprep.subr.bf16.mxu1 %v2279_v23  ;;  %v2491_v20 = vld [vmem:[#allocation7 + $0x90] sm:$0xff]   ;;  %v2492_v21 = vld [vmem:[#allocation7 + $0x48] sm:$0xff]  }
 0x234   :  { %v2493_v23 = vld [vmem:[#allocation7 + $0xc8] sm:$0xff]  }
 0x236   :  { %1398 = vmatpush2.bf16.msra.mxu0 %v2276_v28  ;;  %1439 = vmatpush2.bf16.msra.mxu1 %v2278_v29  ;;  %v2498_v28 = vld [vmem:[#allocation7] sm:$0xff]  }
 0x237   :  { %1399 = vmatprep.subr.bf16.mxu0 %v2269_v30  ;;  %1440 = vmatprep.subr.bf16.mxu1 %v2271_v31  ;;  %v2499_v29 = vld [vmem:[#allocation7 + $0x80] sm:$0xff]   ;;  %v2500_v30 = vld [vmem:[#allocation7 + $0x178] sm:$0xff]  }
 0x238   :  { %v2501_v31 = vld [vmem:[#allocation7 + $0x1f8] sm:$0xff]  }
 0x23a   :  { %1400 = vmatpush2.bf16.msra.mxu0 %v2268_v36  ;;  %1441 = vmatpush2.bf16.msra.mxu1 %v2270_v37  ;;  %v624_v36 = vrot.slane %v2744_v33, %v623_v32  ;;  %v620_v37 = vrot.slane %v2744_v33, %v2722_v14 }
 0x23b   :  { %1401 = vmatprep.subr.bf16.mxu0 %v2261_v38  ;;  %1442 = vmatprep.subr.bf16.mxu1 %v2263_v39  ;;  %v628_v38 = vrot.slane %v2744_v33, %v627_v34 }
 0x23e   :  { %1402 = vmatpush2.bf16.msra.mxu0 %v2260_v44  ;;  %1443 = vmatpush2.bf16.msra.mxu1 %v2262_v45 }
 0x23f   :  { %1403 = vmatprep.subr.bf16.mxu0 %v2253_v46  ;;  %1444 = vmatprep.subr.bf16.mxu1 %v2255_v16 }
 0x242   :  { %1404 = vmatpush2.bf16.msra.mxu0 %v2252_v49  ;;  %1445 = vmatpush2.bf16.msra.mxu1 %v2254_v50 }
 0x243   :  { %1405 = vmatprep.subr.bf16.mxu0 %v2245_v51  ;;  %1446 = vmatprep.subr.bf16.mxu1 %v2247_v52  ;;  %v2502_v52 = vld [vmem:[#allocation7 + $0x138] sm:$0xff]  }
 0x246   :  { %1406 = vmatpush2.bf16.msra.mxu0 %v2244_v53  ;;  %1447 = vmatpush2.bf16.msra.mxu1 %v2246_v54  ;;  %v2503_v53 = vld [vmem:[#allocation7 + $0x1b8] sm:$0xff]  }
 0x247   :  { %2369 = vmatprep.subr.bf16.mxu0 %v2468_v55  ;;  %2391 = vmatprep.subr.bf16.mxu1 %v2469_v56  ;;  %v2504_v56 = vld [vmem:[#allocation7 + $0x170] sm:$0xff]  }
 0x249   :  { %1408 = vmatmul.mubr.bf16.vlgmr.msra.gmra.mxu0 %v2734_v57  ;;  %1449 = vmatmul.mubr.bf16.vlgmr.msra.gmra.mxu1 %v2734_v57  ;;  %v2483_v57 = vld [vmem:[#allocation7 + $0xa0] sm:$0xff]  }
 0x24a   :  { %2370 = vmatpush3.bf16.msra.mxu0 %v2470_v58  ;;  %2392 = vmatpush3.bf16.msra.mxu1 %v2471_v59  ;;  %v2505_v58 = vld [vmem:[#allocation7 + $0x1f0] sm:$0xff]  }
 0x24b   :  { %2371 = vmatprep.subr.bf16.mxu0 %v2472_v60  ;;  %2393 = vmatprep.subr.bf16.mxu1 %v2473_v61  ;;  %v2506_v59 = vld [vmem:[#allocation7 + $0x130] sm:$0xff]   ;;  %v2508_v61 = vld [vmem:[#allocation7 + $0x168] sm:$0xff]  }
 0x24c   :  { %v2507_v60 = vld [vmem:[#allocation7 + $0x1b0] sm:$0xff]  }
 0x24e   :  { %2372 = vmatpush3.bf16.msra.mxu0 %v2474_v62  ;;  %2394 = vmatpush3.bf16.msra.mxu1 %v2475_v63  ;;  %v2509_v62 = vld [vmem:[#allocation7 + $0x1e8] sm:$0xff]  }
 0x24f   :  { %2373 = vmatprep.subr.bf16.mxu0 %v2476_v0  ;;  %2395 = vmatprep.subr.bf16.mxu1 %v2477_v1  ;;  %v2510_v63 = vld [vmem:[#allocation7 + $0x128] sm:$0xff]   ;;  %v2512_v1 = vld [vmem:[#allocation7 + $0x160] sm:$0xff]  }
 0x250   :  { %v2511_v0 = vld [vmem:[#allocation7 + $0x1a8] sm:$0xff]  }
 0x252   :  { %2374 = vmatpush3.bf16.msra.mxu0 %v2478_v2  ;;  %2396 = vmatpush3.bf16.msra.mxu1 %v2479_v3  ;;  %v2513_v2 = vld [vmem:[#allocation7 + $0x1e0] sm:$0xff]  }
 0x253   :  { %2375 = vmatprep.subr.bf16.mxu0 %v2480_v4  ;;  %2397 = vmatprep.subr.bf16.mxu1 %v2481_v5  ;;  %v2514_v3 = vld [vmem:[#allocation7 + $0x120] sm:$0xff]   ;;  %v2516_v5 = vld [vmem:[#allocation7 + $0x158] sm:$0xff]  }
 0x254   :  { %v2515_v4 = vld [vmem:[#allocation7 + $0x1a0] sm:$0xff]  }
 0x256   :  { %2376 = vmatpush3.bf16.msra.mxu0 %v2482_v6  ;;  %2398 = vmatpush3.bf16.msra.mxu1 %v2483_v57  ;;  %v2517_v6 = vld [vmem:[#allocation7 + $0x1d8] sm:$0xff]  }
 0x257   :  { %2377 = vmatprep.subr.bf16.mxu0 %v2484_v7  ;;  %2399 = vmatprep.subr.bf16.mxu1 %v2485_v8  ;;  %v2518_v57 = vld [vmem:[#allocation7 + $0x118] sm:$0xff]   ;;  %v2520_v8 = vld [vmem:[#allocation7 + $0x150] sm:$0xff]  }
 0x258   :  { %v2519_v7 = vld [vmem:[#allocation7 + $0x198] sm:$0xff]  }
 0x25a   :  { %2378 = vmatpush3.bf16.msra.mxu0 %v2486_v9  ;;  %2400 = vmatpush3.bf16.msra.mxu1 %v2487_v13  ;;  %v2521_v9 = vld [vmem:[#allocation7 + $0x1d0] sm:$0xff]  }
 0x25b   :  { %2379 = vmatprep.subr.bf16.mxu0 %v2488_v15  ;;  %2401 = vmatprep.subr.bf16.mxu1 %v2489_v17  ;;  %v2522_v13 = vld [vmem:[#allocation7 + $0x110] sm:$0xff]   ;;  %v2524_v17 = vld [vmem:[#allocation7 + $0x148] sm:$0xff]  }
 0x25c   :  { %v2523_v15 = vld [vmem:[#allocation7 + $0x190] sm:$0xff]  }
 0x25e   :  { %2380 = vmatpush3.bf16.msra.mxu0 %v2490_v18  ;;  %2402 = vmatpush3.bf16.msra.mxu1 %v2491_v20  ;;  %v2525_v18 = vld [vmem:[#allocation7 + $0x1c8] sm:$0xff]  }
 0x25f   :  { %2381 = vmatprep.subr.bf16.mxu0 %v2492_v21  ;;  %2403 = vmatprep.subr.bf16.mxu1 %v2493_v23  ;;  %v2526_v20 = vld [vmem:[#allocation7 + $0x108] sm:$0xff]   ;;  %v2528_v23 = vld [vmem:[#allocation7 + $0x140] sm:$0xff]  }
 0x260   :  { %v2527_v21 = vld [vmem:[#allocation7 + $0x188] sm:$0xff]  }
 0x262   :  { %2382 = vmatpush3.bf16.msra.mxu0 %v2494_v24  ;;  %2404 = vmatpush3.bf16.msra.mxu1 %v2495_v25  ;;  %v2529_v24 = vld [vmem:[#allocation7 + $0x1c0] sm:$0xff]  }
 0x263   :  { %2383 = vmatprep.subr.bf16.mxu0 %v2496_v26  ;;  %2405 = vmatprep.subr.bf16.mxu1 %v2497_v27  ;;  %v2530_v25 = vld [vmem:[#allocation7 + $0x100] sm:$0xff]   ;;  %v631_v27 = vsub.s32 4, %v2713_v11 }
 0x264   :  { %v2531_v26 = vld [vmem:[#allocation7 + $0x180] sm:$0xff]  }
 0x266   :  { %2384 = vmatpush3.bf16.msra.mxu0 %v2498_v28  ;;  %2406 = vmatpush3.bf16.msra.mxu1 %v2499_v29  ;;  %v639_v28 = vsub.s32 6, %v2713_v11  ;;  %v635_v29 = vsub.s32 5, %v2713_v11 }
 0x267   :  { %2413 = vmatprep.subr.bf16.mxu0 %v2500_v30  ;;  %2435 = vmatprep.subr.bf16.mxu1 %v2501_v31  ;;  %v643_v30 = vsub.s32 7, %v2713_v11  ;;  %v632_v31 = vrot.slane %v2744_v33, %v631_v27 }
 0x268   :  { %v640_v32 = vrot.slane %v2744_v33, %v639_v28  ;;  %v636_v34 = vrot.slane %v2744_v33, %v635_v29 }
 0x2c9   :  { %v1327_v39 = vpop.f32.mrf.mxu0  ;;  %v1368_v40 = vpop.f32.mrf.mxu1 }
 0x2ca   :  { %v1328_v41 = vadd.f32 %v1327_v39, %v616_v35  ;;  %v1369_v42 = vadd.f32 %v1368_v40, %v624_v36  ;;  %v644_v35 = vrot.slane %v2744_v33, %v643_v30 }
 0x2cb   :  { %v1329_v43 = vpop.f32.mrf.mxu0  ;;  %v1370_v44 = vpop.f32.mrf.mxu1 }
 0x2cc   :  { %v1330_v45 = vadd.f32 %v1329_v43, %v620_v37  ;;  %v1371_v46 = vadd.f32 %v1370_v44, %v628_v38  ;;  %v1457_v16 = vmax.f32 %v1328_v41, 0.0  ;;  %v1459_v19 = vmax.f32 %v1369_v42, 0.0 }
 0x2cd   :  { %v1331_v22 = vpop.f32.mrf.mxu0  ;;  %v1372_v47 = vpop.f32.mrf.mxu1 }
 0x2ce   :  { %v1458_v12 = vmax.f32 %v1330_v45, 0.0  ;;  %v1460_v48 = vmax.f32 %v1371_v46, 0.0  ;;  %v1465_v54 = vpack.c.bf16 %v1457_v16, %v1457_v16  ;;  %v1467_v55 = vpack.c.bf16 %v1459_v19, %v1459_v19 }
 0x2cf   :  { %v1332_v49 = vpop.f32.mrf.mxu0  ;;  %v1373_v50 = vpop.f32.mrf.mxu1 }
 0x2d0   :  { %v1466_v51 = vpack.c.bf16 %v1458_v12, %v1458_v12  ;;  %v1468_v14 = vpack.c.bf16 %v1460_v48, %v1460_v48 }
 0x2d2   :  { %2024 = vmatprep.mubr.bf16.mxu0 %v1466_v51  ;;  %2064 = vmatprep.mubr.bf16.mxu1 %v1468_v14 }
 0x2d3   :  { %2025 = vmatmul.mubr.bf16.vlgmr.msra.gmra.mxu0 %v1465_v54  ;;  %2065 = vmatmul.mubr.bf16.vlgmr.msra.gmra.mxu1 %v1467_v55 }
 0x2d4   :  { %2414 = vmatpush3.bf16.msra.mxu0 %v2502_v52  ;;  %2436 = vmatpush3.bf16.msra.mxu1 %v2503_v53 }
 0x2d5   :  { %2415 = vmatprep.subr.bf16.mxu0 %v2504_v56  ;;  %2437 = vmatprep.subr.bf16.mxu1 %v2505_v58 }
 0x2d8   :  { %2416 = vmatpush3.bf16.msra.mxu0 %v2506_v59  ;;  %2438 = vmatpush3.bf16.msra.mxu1 %v2507_v60  ;;  %v2304_v59 = vld [vmem:[%s2776_s8] ss:$0 sm:$0xff] }
 0x2d9   :  { %2417 = vmatprep.subr.bf16.mxu0 %v2508_v61  ;;  %2439 = vmatprep.subr.bf16.mxu1 %v2509_v62 }
 0x2dc   :  { %2418 = vmatpush3.bf16.msra.mxu0 %v2510_v63  ;;  %2440 = vmatpush3.bf16.msra.mxu1 %v2511_v0 }
 0x2dd   :  { %2419 = vmatprep.subr.bf16.mxu0 %v2512_v1  ;;  %2441 = vmatprep.subr.bf16.mxu1 %v2513_v2  ;;  %v2153_v2 = vand.u32 127, %v167_v10 }
 0x2df   :  { %vm2154_vm2 = vcmp.lt.s32.totalorder %v2153_v2, 10 }
 0x2e0   :  { %2420 = vmatpush3.bf16.msra.mxu0 %v2514_v3  ;;  %2442 = vmatpush3.bf16.msra.mxu1 %v2515_v4 }
 0x2e1   :  { %2421 = vmatprep.subr.bf16.mxu0 %v2516_v5  ;;  %2443 = vmatprep.subr.bf16.mxu1 %v2517_v6 }
 0x2e4   :  { %2422 = vmatpush3.bf16.msra.mxu0 %v2518_v57  ;;  %2444 = vmatpush3.bf16.msra.mxu1 %v2519_v7 }
 0x2e5   :  { %2423 = vmatprep.subr.bf16.mxu0 %v2520_v8  ;;  %2445 = vmatprep.subr.bf16.mxu1 %v2521_v9 }
 0x2e8   :  { %2424 = vmatpush3.bf16.msra.mxu0 %v2522_v13  ;;  %2446 = vmatpush3.bf16.msra.mxu1 %v2523_v15 }
 0x2e9   :  { %2425 = vmatprep.subr.bf16.mxu0 %v2524_v17  ;;  %2447 = vmatprep.subr.bf16.mxu1 %v2525_v18 }
 0x2ec   :  { %2426 = vmatpush3.bf16.msra.mxu0 %v2526_v20  ;;  %2448 = vmatpush3.bf16.msra.mxu1 %v2527_v21 }
 0x2ed   :  { %2427 = vmatprep.subr.bf16.mxu0 %v2528_v23  ;;  %2449 = vmatprep.subr.bf16.mxu1 %v2529_v24 }
 0x2f0   :  { %2428 = vmatpush3.bf16.msra.mxu0 %v2530_v25  ;;  %2450 = vmatpush3.bf16.msra.mxu1 %v2531_v26 }
 0x309   :  { %v1409_v36 = vpop.f32.mrf.mxu0  ;;  %v1450_v37 = vpop.f32.mrf.mxu1 }
 0x30a   :  { %v1410_v38 = vadd.f32 %v1409_v36, %v632_v31  ;;  %v1451_v39 = vadd.f32 %v1450_v37, %v640_v32 }
 0x30b   :  { %v1411_v40 = vpop.f32.mrf.mxu0  ;;  %v1452_v41 = vpop.f32.mrf.mxu1 }
 0x30c   :  { %v1412_v42 = vadd.f32 %v1411_v40, %v636_v34  ;;  %v1453_v43 = vadd.f32 %v1452_v41, %v644_v35  ;;  %v1461_v44 = vmax.f32 %v1410_v38, 0.0  ;;  %v1463_v45 = vmax.f32 %v1451_v39, 0.0 }
 0x30d   :  { %v1413_v46 = vpop.f32.mrf.mxu0  ;;  %v1454_v11 = vpop.f32.mrf.mxu1 }
 0x30e   :  { %v1462_v16 = vmax.f32 %v1412_v42, 0.0  ;;  %v1464_v19 = vmax.f32 %v1453_v43, 0.0  ;;  %v1469_v49 = vpack.c.bf16 %v1461_v44, %v1461_v44  ;;  %v1471_v33 = vpack.c.bf16 %v1463_v45, %v1463_v45 }
 0x30f   :  { %v1414_v22 = vpop.f32.mrf.mxu0  ;;  %v1455_v47 = vpop.f32.mrf.mxu1 }
 0x310   :  { %v1470_v12 = vpack.c.bf16 %v1462_v16, %v1462_v16  ;;  %v1472_v48 = vpack.c.bf16 %v1464_v19, %v1464_v19 }
 0x312   :  { %2104 = vmatprep.mubr.bf16.mxu0 %v1470_v12  ;;  %2144 = vmatprep.mubr.bf16.mxu1 %v1472_v48 }
 0x313   :  { %2105 = vmatmul.mubr.bf16.vlgmr.msra.gmra.mxu0 %v1469_v49  ;;  %2145 = vmatmul.mubr.bf16.vlgmr.msra.gmra.mxu1 %v1471_v33 }
 0x393   :  { %v2385_v50 = vpop.f32.mrf.mxu0  ;;  %v2407_v51 = vpop.f32.mrf.mxu1 }
 0x395   :  { %v2386_v14 = vpop.f32.mrf.mxu0  ;;  %v2408_v52 = vpop.f32.mrf.mxu1 }
 0x396   :  { %v2387_v58 = vadd.f32 %v2386_v14, %v2385_v50  ;;  %v2409_v63 = vadd.f32 %v2408_v52, %v2407_v51 }
 0x397   :  { %v2388_v53 = vpop.f32.mrf.mxu0  ;;  %v2410_v54 = vpop.f32.mrf.mxu1 }
 0x398   :  { %v2027_v60 = vadd.f32 %v2387_v58, %v2304_v59 }
 0x399   :  { %v2389_v55 = vpop.f32.mrf.mxu0  ;;  %v2411_v56 = vpop.f32.mrf.mxu1 }
 0x39a   :  { %v2067_v3 = vadd.f32 %v2409_v63, %v2027_v60 }
 0x3d3   :  { %v2429_v61 = vpop.f32.mrf.mxu0  ;;  %v2451_v62 = vpop.f32.mrf.mxu1 }
 0x3d5   :  { %v2430_v0 = vpop.f32.mrf.mxu0  ;;  %v2452_v1 = vpop.f32.mrf.mxu1 }
 0x3d6   :  { %v2431_v4 = vadd.f32 %v2430_v0, %v2429_v61  ;;  %v2453_v7 = vadd.f32 %v2452_v1, %v2451_v62 }
 0x3d7   :  { %v2432_v5 = vpop.f32.mrf.mxu0  ;;  %v2454_v6 = vpop.f32.mrf.mxu1 }
 0x3d8   :  { %v2107_v57 = vadd.f32 %v2431_v4, %v2067_v3 }
 0x3d9   :  { %v2433_v8 = vpop.f32.mrf.mxu0  ;;  %v2455_v9 = vpop.f32.mrf.mxu1 }
 0x3da   :  { %v2147_v13 = vadd.f32 %v2453_v7, %v2107_v57 }
 0x3dc   :  { %v2155_v15 = vsel %vm2154_vm2, %v2147_v13, -1e+30 }
 0x3dd   :  { %2156 = vmax.xlane.f32.xlu0 %v2155_v15 }
 0x466   :  { %v2157_v17 = vpop.xlane.xlu0 %2156 }
 0x467   :  { %v2158_v18 = vsub.f32 %v2155_v15, %v2157_v17 }
 0x469   :  { %v2159_v20 = vmul.f32 1.442695, %v2158_v18 }
 0x46b   :  { %2532 = vpow2.f32 %v2159_v20 }
 0x478   :  { %v2533_v21 = vpop.eup %2532 }
 0x479   :  { %2161 = vadd.xlane.f32.xlu0 %v2533_v21 }
 0x502   :  { %v2162_v23 = vpop.xlane.xlu0 %2161 }
 0x503   :  { %2534 = vrcp.f32 %v2162_v23 }
 0x510   :  { %v2535_v10 = vpop.eup %2534 }
 0x511   :  { %v2164_v24 = vmul.f32 %v2535_v10, %v2533_v21 }
 0x513   :  { %2165 = vst [vmem:[%s2777_s9] sm:$0xff] %v2164_v24 }
 0x514   :  { %2170 = vsyncpa [#allocation3], 1 }
 0x515   :  { %2171 = vsyncpa [#allocation5], 1 }
 0x516   :  { %2172 = vsyncpa [#allocation8], 1 }

</bundles_post_ra>
